<compile_context>
chip_gen: v7x
topology: tpu7x:2x2x1
jax: 0.10.0
libtpu: 0.0.40
codegen_flags: <defaults>
</compile_context>

<pallas_src>
import functools

import numpy as np
import jax
import jax.numpy as jnp
from jax import lax
from jax.experimental import pallas as pl
from jax.experimental.pallas import tpu as pltpu


# ----------------------------- Pallas kernel ------------------------------- #

def _dis_block_kernel(x_ref, p_ref, s1_ref, w1_ref, b1_ref,
                      s2_ref, w2_ref, b2_ref, o_ref):
    """Fused avg_pool(2,2) + conv+LeakyReLU + conv+LeakyReLU for one image.

    Layout: channels on sublanes, flattened spatial pixels on lanes.
      x_ref  : (1, Cin, H*W)      NCHW image, spatially flattened
      p_ref  : (H*W, Mp)          avg-pool matrix (Mp = (H//2)*(W//2))
      s?_ref : (k*k, Min, Mout)   per-tap shift/select matrices (0/1)
      w?_ref : (k*k, Cout, Cin)   per-tap weight slices  w[:, :, ki, kj]
      b?_ref : (Cout, 1)
      o_ref  : (1, Cout, Mout2)
    """
    f32 = jnp.float32
    kk = s1_ref.shape[0]

    xt = x_ref[0].astype(f32)                                        # (Cin, H*W)
    pooled = jnp.dot(xt, p_ref[...], preferred_element_type=f32)     # (Cin, Mp)

    # ---- layer 1: conv (per-tap matmul form) + bias + LeakyReLU(0.2) ----
    cout1, m1 = w1_ref.shape[1], s1_ref.shape[2]
    acc1 = jnp.broadcast_to(b1_ref[...], (cout1, m1)).astype(f32)    # bias init
    for t in range(kk):                                              # unrolled
        shifted = jnp.dot(pooled, s1_ref[t], preferred_element_type=f32)   # (Cin, M1)
        acc1 = acc1 + jnp.dot(w1_ref[t], shifted, preferred_element_type=f32)
    y1 = jnp.where(acc1 > 0, acc1, 0.2 * acc1)                       # (Cout, M1)

    # ---- layer 2 ----
    cout2, m2 = w2_ref.shape[1], s2_ref.shape[2]
    acc2 = jnp.broadcast_to(b2_ref[...], (cout2, m2)).astype(f32)
    for t in range(kk):
        shifted = jnp.dot(y1, s2_ref[t], preferred_element_type=f32)       # (Cout, M2)
        acc2 = acc2 + jnp.dot(w2_ref[t], shifted, preferred_element_type=f32)
    y2 = jnp.where(acc2 > 0, acc2, 0.2 * acc2)                       # (Cout, M2)

    o_ref[0] = y2.astype(o_ref.dtype)


# ------------------- constant pooling / shift matrix glue ------------------ #

def _pool_matrix(H, W):
    """(H*W, H2*W2) matrix M s.t. x_flat @ M == avg_pool2d(x, 2, 2) flattened."""
    H2, W2 = H // 2, W // 2
    P = np.zeros((H * W, H2 * W2), np.float32)
    for a in range(H2):
        for b in range(W2):
            q = a * W2 + b
            for da in range(2):
                for db in range(2):
                    P[(2 * a + da) * W + (2 * b + db), q] = 0.25
    return P


def _shift_matrices(Hin, Win, k, stride, pad):
    """(k*k, Hin*Win, Ho*Wo) 0/1 selection matrices: one per conv tap."""
    Ho = (Hin + 2 * pad - k) // stride + 1
    Wo = (Win + 2 * pad - k) // stride + 1
    S = np.zeros((k * k, Hin * Win, Ho * Wo), np.float32)
    for ki in range(k):
        for kj in range(k):
            t = ki * k + kj
            for i in range(Ho):
                for j in range(Wo):
                    a = i * stride + ki - pad
                    b = j * stride + kj - pad
                    if 0 <= a < Hin and 0 <= b < Win:
                        S[t, a * Win + b, i * Wo + j] = 1.0
    return S, Ho, Wo


# ------------------------- parameter setup (glue) --------------------------- #

def spectral_normalize_np(w_oihw, n_iter=30):
    """W / sigma_max(W reshaped to (c_out, -1)); deterministic power iteration.

    Done on the host in numpy (snconv2d == spectral_norm(nn.Conv2d)) so the
    TPU only ever sees the already-normalized weights.
    """
    w2 = np.asarray(w_oihw, np.float64).reshape(w_oihw.shape[0], -1)
    u = np.ones((w2.shape[0],), np.float64) / np.sqrt(w2.shape[0])
    v = None
    for _ in range(n_iter):
        v = w2.T @ u
        v = v / (np.linalg.norm(v) + 1e-12)
        u = w2 @ v
        u = u / (np.linalg.norm(u) + 1e-12)
    sigma = u @ (w2 @ v)
    return np.asarray(w_oihw / sigma, np.float32)


def make_params(key, c_in, c_out, k):
    k1, k2, k3, k4 = jax.random.split(key, 4)
    w1 = spectral_normalize_np(
        0.1 * np.asarray(jax.random.normal(k1, (c_out, c_in, k, k), jnp.float32)))
    b1 = 0.1 * jax.random.normal(k2, (c_out,), jnp.float32)
    w2 = spectral_normalize_np(
        0.1 * np.asarray(jax.random.normal(k3, (c_out, c_out, k, k), jnp.float32)))
    b2 = 0.1 * jax.random.normal(k4, (c_out,), jnp.float32)
    return dict(w1=jnp.asarray(w1), b1=b1, w2=jnp.asarray(w2), b2=b2)


# ------------------------------- forward pass ------------------------------- #

@functools.partial(jax.jit, static_argnames=("k", "stride", "pad"))
def dis_block_forward(x_nchw, params, *, k, stride, pad):
    N, Cin, H, W = x_nchw.shape
    Cout = params["w1"].shape[0]
    H2, W2 = H // 2, W // 2

    # compile-time constants (numpy, built at trace time)
    P = _pool_matrix(H, W)                                    # (H*W, Mp)
    S1, Ho1, Wo1 = _shift_matrices(H2, W2, k, stride, pad)    # (k*k, Mp, M1)
    S2, Ho2, Wo2 = _shift_matrices(Ho1, Wo1, k, stride, pad)  # (k*k, M1, M2)
    Mp, M1, M2 = H2 * W2, Ho1 * Wo1, Ho2 * Wo2

    # per-tap weight slices  w[:, :, ki, kj] -> (k*k, Cout, Cin)
    w1t = jnp.transpose(params["w1"], (2, 3, 0, 1)).reshape(k * k, Cout, Cin)
    w2t = jnp.transpose(params["w2"], (2, 3, 0, 1)).reshape(k * k, Cout, Cout)
    b1 = params["b1"].reshape(Cout, 1)
    b2 = params["b2"].reshape(Cout, 1)

    x_flat = x_nchw.reshape(N, Cin, H * W)                    # free reshape (NCHW kept)

    out = pl.pallas_call(
        _dis_block_kernel,
        grid=(N,),
        in_specs=[
            pl.BlockSpec((1, Cin, H * W), lambda n: (n, 0, 0)),
            pl.BlockSpec((H * W, Mp), lambda n: (0, 0)),
            pl.BlockSpec((k * k, Mp, M1), lambda n: (0, 0, 0)),
            pl.BlockSpec((k * k, Cout, Cin), lambda n: (0, 0, 0)),
            pl.BlockSpec((Cout, 1), lambda n: (0, 0)),
            pl.BlockSpec((k * k, M1, M2), lambda n: (0, 0, 0)),
            pl.BlockSpec((k * k, Cout, Cout), lambda n: (0, 0, 0)),
            pl.BlockSpec((Cout, 1), lambda n: (0, 0)),
        ],
        out_specs=pl.BlockSpec((1, Cout, M2), lambda n: (n, 0, 0)),
        out_shape=jax.ShapeDtypeStruct((N, Cout, M2), x_nchw.dtype),
        compiler_params=pltpu.CompilerParams(
            dimension_semantics=("parallel",)),
    )(x_flat, jnp.asarray(P), jnp.asarray(S1), w1t, b1,
      jnp.asarray(S2), w2t, b2)

    return out.reshape(N, Cout, Ho2, Wo2)                     # free reshape -> NCHW


# -------------------------- pure-JAX reference ------------------------------ #

def dis_block_reference(x_nchw, params, *, k, stride, pad):
    x = jnp.transpose(x_nchw, (0, 2, 3, 1))
    x = lax.reduce_window(x, 0.0, lax.add, (1, 2, 2, 1), (1, 2, 2, 1),
                          "VALID") / 4.0

    def conv(x, w_oihw, b):
        w_hwio = jnp.transpose(w_oihw, (2, 3, 1, 0))
        y = lax.conv_general_dilated(
            x, w_hwio, window_strides=(stride, stride),
            padding=[(pad, pad), (pad, pad)],
            dimension_numbers=("NHWC", "HWIO", "NHWC")) + b
        return jnp.where(y > 0, y, 0.2 * y)

    x = conv(x, params["w1"], params["b1"])
    x = conv(x, params["w2"], params["b2"])
    return jnp.transpose(x, (0, 3, 1, 2))


# ----------------------------------- main ----------------------------------- #

if __name__ == "__main__":
    # Dis_Block(c_in=4, c_out=8, k_size=3, stride=1, pad=1)
    c_in, c_out, k_size, stride, pad = 4, 8, 3, 1, 1
    N, H, W = 2, 16, 16

    key = jax.random.PRNGKey(0)
    kx, kp = jax.random.split(key)
    x = jax.random.normal(kx, (N, c_in, H, W), jnp.float32)
    params = make_params(kp, c_in, c_out, k_size)

    out = dis_block_forward(x, params, k=k_size, stride=stride, pad=pad)
    out = jax.block_until_ready(out)

    ref = dis_block_reference(x, params, k=k_size, stride=stride, pad=pad)
    assert out.shape == (N, c_out, H // 2, W // 2), out.shape
    assert jnp.allclose(out, ref, atol=3e-2, rtol=3e-2), (
        float(jnp.max(jnp.abs(out - ref))))

    print("KERNEL_OK")
</pallas_src>

<mosaic_0001>
module attributes {stable_mosaic.version = 11 : i64} {
  func.func @_dis_block_kernel(%arg0: i32, %arg1: memref<1x4x256xf32, #tpu.memory_space<vmem>>, %arg2: memref<256x64xf32, #tpu.memory_space<vmem>>, %arg3: memref<9x64x64xf32, #tpu.memory_space<vmem>>, %arg4: memref<9x8x4xf32, #tpu.memory_space<vmem>>, %arg5: memref<8x1xf32, #tpu.memory_space<vmem>>, %arg6: memref<9x64x64xf32, #tpu.memory_space<vmem>>, %arg7: memref<9x8x8xf32, #tpu.memory_space<vmem>>, %arg8: memref<8x1xf32, #tpu.memory_space<vmem>>, %arg9: memref<1x8x64xf32, #tpu.memory_space<vmem>>) attributes {dimension_semantics = [#tpu.dimension_semantics<parallel>], iteration_bounds = array<i64: 2>, scalar_prefetch = 0 : i64, scratch_operands = 0 : i64, tpu.core_type = #tpu.core_type<tc>, window_params = [{transform_indices = @transform_0, window_bounds = array<i64: 1, 4, 256>}, {pipeline_mode = #tpu.pipeline_mode<synchronous>, transform_indices = @transform_1, window_bounds = array<i64: 256, 64>}, {pipeline_mode = #tpu.pipeline_mode<synchronous>, transform_indices = @transform_2, window_bounds = array<i64: 9, 64, 64>}, {pipeline_mode = #tpu.pipeline_mode<synchronous>, transform_indices = @transform_3, window_bounds = array<i64: 9, 8, 4>}, {pipeline_mode = #tpu.pipeline_mode<synchronous>, transform_indices = @transform_4, window_bounds = array<i64: 8, 1>}, {pipeline_mode = #tpu.pipeline_mode<synchronous>, transform_indices = @transform_5, window_bounds = array<i64: 9, 64, 64>}, {pipeline_mode = #tpu.pipeline_mode<synchronous>, transform_indices = @transform_6, window_bounds = array<i64: 9, 8, 8>}, {pipeline_mode = #tpu.pipeline_mode<synchronous>, transform_indices = @transform_7, window_bounds = array<i64: 8, 1>}, {transform_indices = @transform_8, window_bounds = array<i64: 1, 8, 64>}]} {
    %c0 = arith.constant 0 : index
    %c0_0 = arith.constant 0 : index
    %c0_1 = arith.constant 0 : index
    %0 = vector.load %arg1[%c0, %c0_0, %c0_1] : memref<1x4x256xf32, #tpu.memory_space<vmem>>, vector<1x4x256xf32>
    %1 = vector.shape_cast %0 : vector<1x4x256xf32> to vector<4x256xf32>
    %c0_2 = arith.constant 0 : index
    %c0_3 = arith.constant 0 : index
    %2 = vector.load %arg2[%c0_2, %c0_3] : memref<256x64xf32, #tpu.memory_space<vmem>>, vector<256x64xf32>
    %cst = arith.constant dense<0.000000e+00> : vector<4x64xf32>
    %3 = tpu.matmul %1, %2, %cst {dimension_numbers = #tpu.dot_dimension_numbers<[1], [0], [0], [1], [0, 0, 1, 1], [], []>} : vector<4x256xf32>, vector<256x64xf32>, vector<4x64xf32> -> vector<4x64xf32>
    %c0_4 = arith.constant 0 : index
    %c0_5 = arith.constant 0 : index
    %4 = vector.load %arg5[%c0_4, %c0_5] : memref<8x1xf32, #tpu.memory_space<vmem>>, vector<8x1xf32>
    %5 = vector.shape_cast %4 : vector<8x1xf32> to vector<8x1xf32>
    %6 = vector.broadcast %5 : vector<8x1xf32> to vector<8x64xf32>
    %c0_6 = arith.constant 0 : index
    %c0_7 = arith.constant 0 : index
    %c0_8 = arith.constant 0 : index
    %7 = vector.load %arg3[%c0_6, %c0_7, %c0_8] : memref<9x64x64xf32, #tpu.memory_space<vmem>>, vector<1x64x64xf32>
    %8 = vector.shape_cast %7 : vector<1x64x64xf32> to vector<64x64xf32>
    %cst_9 = arith.constant dense<0.000000e+00> : vector<4x64xf32>
    %9 = tpu.matmul %3, %8, %cst_9 {dimension_numbers = #tpu.dot_dimension_numbers<[1], [0], [0], [1], [0, 0, 1, 1], [], []>} : vector<4x64xf32>, vector<64x64xf32>, vector<4x64xf32> -> vector<4x64xf32>
    %c0_10 = arith.constant 0 : index
    %c0_11 = arith.constant 0 : index
    %c0_12 = arith.constant 0 : index
    %10 = vector.load %arg4[%c0_10, %c0_11, %c0_12] : memref<9x8x4xf32, #tpu.memory_space<vmem>>, vector<1x8x4xf32>
    %11 = vector.shape_cast %10 : vector<1x8x4xf32> to vector<8x4xf32>
    %cst_13 = arith.constant dense<0.000000e+00> : vector<8x64xf32>
    %12 = tpu.matmul %11, %9, %cst_13 {dimension_numbers = #tpu.dot_dimension_numbers<[1], [0], [0], [1], [0, 0, 1, 1], [], []>} : vector<8x4xf32>, vector<4x64xf32>, vector<8x64xf32> -> vector<8x64xf32>
    %13 = arith.addf %6, %12 : vector<8x64xf32>
    %c1 = arith.constant 1 : index
    %c0_14 = arith.constant 0 : index
    %c0_15 = arith.constant 0 : index
    %14 = vector.load %arg3[%c1, %c0_14, %c0_15] : memref<9x64x64xf32, #tpu.memory_space<vmem>>, vector<1x64x64xf32>
    %15 = vector.shape_cast %14 : vector<1x64x64xf32> to vector<64x64xf32>
    %cst_16 = arith.constant dense<0.000000e+00> : vector<4x64xf32>
    %16 = tpu.matmul %3, %15, %cst_16 {dimension_numbers = #tpu.dot_dimension_numbers<[1], [0], [0], [1], [0, 0, 1, 1], [], []>} : vector<4x64xf32>, vector<64x64xf32>, vector<4x64xf32> -> vector<4x64xf32>
    %c1_17 = arith.constant 1 : index
    %c0_18 = arith.constant 0 : index
    %c0_19 = arith.constant 0 : index
    %17 = vector.load %arg4[%c1_17, %c0_18, %c0_19] : memref<9x8x4xf32, #tpu.memory_space<vmem>>, vector<1x8x4xf32>
    %18 = vector.shape_cast %17 : vector<1x8x4xf32> to vector<8x4xf32>
    %cst_20 = arith.constant dense<0.000000e+00> : vector<8x64xf32>
    %19 = tpu.matmul %18, %16, %cst_20 {dimension_numbers = #tpu.dot_dimension_numbers<[1], [0], [0], [1], [0, 0, 1, 1], [], []>} : vector<8x4xf32>, vector<4x64xf32>, vector<8x64xf32> -> vector<8x64xf32>
    %20 = arith.addf %13, %19 : vector<8x64xf32>
    %c2 = arith.constant 2 : index
    %c0_21 = arith.constant 0 : index
    %c0_22 = arith.constant 0 : index
    %21 = vector.load %arg3[%c2, %c0_21, %c0_22] : memref<9x64x64xf32, #tpu.memory_space<vmem>>, vector<1x64x64xf32>
    %22 = vector.shape_cast %21 : vector<1x64x64xf32> to vector<64x64xf32>
    %cst_23 = arith.constant dense<0.000000e+00> : vector<4x64xf32>
    %23 = tpu.matmul %3, %22, %cst_23 {dimension_numbers = #tpu.dot_dimension_numbers<[1], [0], [0], [1], [0, 0, 1, 1], [], []>} : vector<4x64xf32>, vector<64x64xf32>, vector<4x64xf32> -> vector<4x64xf32>
    %c2_24 = arith.constant 2 : index
    %c0_25 = arith.constant 0 : index
    %c0_26 = arith.constant 0 : index
    %24 = vector.load %arg4[%c2_24, %c0_25, %c0_26] : memref<9x8x4xf32, #tpu.memory_space<vmem>>, vector<1x8x4xf32>
    %25 = vector.shape_cast %24 : vector<1x8x4xf32> to vector<8x4xf32>
    %cst_27 = arith.constant dense<0.000000e+00> : vector<8x64xf32>
    %26 = tpu.matmul %25, %23, %cst_27 {dimension_numbers = #tpu.dot_dimension_numbers<[1], [0], [0], [1], [0, 0, 1, 1], [], []>} : vector<8x4xf32>, vector<4x64xf32>, vector<8x64xf32> -> vector<8x64xf32>
    %27 = arith.addf %20, %26 : vector<8x64xf32>
    %c3 = arith.constant 3 : index
    %c0_28 = arith.constant 0 : index
    %c0_29 = arith.constant 0 : index
    %28 = vector.load %arg3[%c3, %c0_28, %c0_29] : memref<9x64x64xf32, #tpu.memory_space<vmem>>, vector<1x64x64xf32>
    %29 = vector.shape_cast %28 : vector<1x64x64xf32> to vector<64x64xf32>
    %cst_30 = arith.constant dense<0.000000e+00> : vector<4x64xf32>
    %30 = tpu.matmul %3, %29, %cst_30 {dimension_numbers = #tpu.dot_dimension_numbers<[1], [0], [0], [1], [0, 0, 1, 1], [], []>} : vector<4x64xf32>, vector<64x64xf32>, vector<4x64xf32> -> vector<4x64xf32>
    %c3_31 = arith.constant 3 : index
    %c0_32 = arith.constant 0 : index
    %c0_33 = arith.constant 0 : index
    %31 = vector.load %arg4[%c3_31, %c0_32, %c0_33] : memref<9x8x4xf32, #tpu.memory_space<vmem>>, vector<1x8x4xf32>
    %32 = vector.shape_cast %31 : vector<1x8x4xf32> to vector<8x4xf32>
    %cst_34 = arith.constant dense<0.000000e+00> : vector<8x64xf32>
    %33 = tpu.matmul %32, %30, %cst_34 {dimension_numbers = #tpu.dot_dimension_numbers<[1], [0], [0], [1], [0, 0, 1, 1], [], []>} : vector<8x4xf32>, vector<4x64xf32>, vector<8x64xf32> -> vector<8x64xf32>
    %34 = arith.addf %27, %33 : vector<8x64xf32>
    %c4 = arith.constant 4 : index
    %c0_35 = arith.constant 0 : index
    %c0_36 = arith.constant 0 : index
    %35 = vector.load %arg3[%c4, %c0_35, %c0_36] : memref<9x64x64xf32, #tpu.memory_space<vmem>>, vector<1x64x64xf32>
    %36 = vector.shape_cast %35 : vector<1x64x64xf32> to vector<64x64xf32>
    %cst_37 = arith.constant dense<0.000000e+00> : vector<4x64xf32>
    %37 = tpu.matmul %3, %36, %cst_37 {dimension_numbers = #tpu.dot_dimension_numbers<[1], [0], [0], [1], [0, 0, 1, 1], [], []>} : vector<4x64xf32>, vector<64x64xf32>, vector<4x64xf32> -> vector<4x64xf32>
    %c4_38 = arith.constant 4 : index
    %c0_39 = arith.constant 0 : index
    %c0_40 = arith.constant 0 : index
    %38 = vector.load %arg4[%c4_38, %c0_39, %c0_40] : memref<9x8x4xf32, #tpu.memory_space<vmem>>, vector<1x8x4xf32>
    %39 = vector.shape_cast %38 : vector<1x8x4xf32> to vector<8x4xf32>
    %cst_41 = arith.constant dense<0.000000e+00> : vector<8x64xf32>
    %40 = tpu.matmul %39, %37, %cst_41 {dimension_numbers = #tpu.dot_dimension_numbers<[1], [0], [0], [1], [0, 0, 1, 1], [], []>} : vector<8x4xf32>, vector<4x64xf32>, vector<8x64xf32> -> vector<8x64xf32>
    %41 = arith.addf %34, %40 : vector<8x64xf32>
    %c5 = arith.constant 5 : index
    %c0_42 = arith.constant 0 : index
    %c0_43 = arith.constant 0 : index
    %42 = vector.load %arg3[%c5, %c0_42, %c0_43] : memref<9x64x64xf32, #tpu.memory_space<vmem>>, vector<1x64x64xf32>
    %43 = vector.shape_cast %42 : vector<1x64x64xf32> to vector<64x64xf32>
    %cst_44 = arith.constant dense<0.000000e+00> : vector<4x64xf32>
    %44 = tpu.matmul %3, %43, %cst_44 {dimension_numbers = #tpu.dot_dimension_numbers<[1], [0], [0], [1], [0, 0, 1, 1], [], []>} : vector<4x64xf32>, vector<64x64xf32>, vector<4x64xf32> -> vector<4x64xf32>
    %c5_45 = arith.constant 5 : index
    %c0_46 = arith.constant 0 : index
    %c0_47 = arith.constant 0 : index
    %45 = vector.load %arg4[%c5_45, %c0_46, %c0_47] : memref<9x8x4xf32, #tpu.memory_space<vmem>>, vector<1x8x4xf32>
    %46 = vector.shape_cast %45 : vector<1x8x4xf32> to vector<8x4xf32>
    %cst_48 = arith.constant dense<0.000000e+00> : vector<8x64xf32>
    %47 = tpu.matmul %46, %44, %cst_48 {dimension_numbers = #tpu.dot_dimension_numbers<[1], [0], [0], [1], [0, 0, 1, 1], [], []>} : vector<8x4xf32>, vector<4x64xf32>, vector<8x64xf32> -> vector<8x64xf32>
    %48 = arith.addf %41, %47 : vector<8x64xf32>
    %c6 = arith.constant 6 : index
    %c0_49 = arith.constant 0 : index
    %c0_50 = arith.constant 0 : index
    %49 = vector.load %arg3[%c6, %c0_49, %c0_50] : memref<9x64x64xf32, #tpu.memory_space<vmem>>, vector<1x64x64xf32>
    %50 = vector.shape_cast %49 : vector<1x64x64xf32> to vector<64x64xf32>
    %cst_51 = arith.constant dense<0.000000e+00> : vector<4x64xf32>
    %51 = tpu.matmul %3, %50, %cst_51 {dimension_numbers = #tpu.dot_dimension_numbers<[1], [0], [0], [1], [0, 0, 1, 1], [], []>} : vector<4x64xf32>, vector<64x64xf32>, vector<4x64xf32> -> vector<4x64xf32>
    %c6_52 = arith.constant 6 : index
    %c0_53 = arith.constant 0 : index
    %c0_54 = arith.constant 0 : index
    %52 = vector.load %arg4[%c6_52, %c0_53, %c0_54] : memref<9x8x4xf32, #tpu.memory_space<vmem>>, vector<1x8x4xf32>
    %53 = vector.shape_cast %52 : vector<1x8x4xf32> to vector<8x4xf32>
    %cst_55 = arith.constant dense<0.000000e+00> : vector<8x64xf32>
    %54 = tpu.matmul %53, %51, %cst_55 {dimension_numbers = #tpu.dot_dimension_numbers<[1], [0], [0], [1], [0, 0, 1, 1], [], []>} : vector<8x4xf32>, vector<4x64xf32>, vector<8x64xf32> -> vector<8x64xf32>
    %55 = arith.addf %48, %54 : vector<8x64xf32>
    %c7 = arith.constant 7 : index
    %c0_56 = arith.constant 0 : index
    %c0_57 = arith.constant 0 : index
    %56 = vector.load %arg3[%c7, %c0_56, %c0_57] : memref<9x64x64xf32, #tpu.memory_space<vmem>>, vector<1x64x64xf32>
    %57 = vector.shape_cast %56 : vector<1x64x64xf32> to vector<64x64xf32>
    %cst_58 = arith.constant dense<0.000000e+00> : vector<4x64xf32>
    %58 = tpu.matmul %3, %57, %cst_58 {dimension_numbers = #tpu.dot_dimension_numbers<[1], [0], [0], [1], [0, 0, 1, 1], [], []>} : vector<4x64xf32>, vector<64x64xf32>, vector<4x64xf32> -> vector<4x64xf32>
    %c7_59 = arith.constant 7 : index
    %c0_60 = arith.constant 0 : index
    %c0_61 = arith.constant 0 : index
    %59 = vector.load %arg4[%c7_59, %c0_60, %c0_61] : memref<9x8x4xf32, #tpu.memory_space<vmem>>, vector<1x8x4xf32>
    %60 = vector.shape_cast %59 : vector<1x8x4xf32> to vector<8x4xf32>
    %cst_62 = arith.constant dense<0.000000e+00> : vector<8x64xf32>
    %61 = tpu.matmul %60, %58, %cst_62 {dimension_numbers = #tpu.dot_dimension_numbers<[1], [0], [0], [1], [0, 0, 1, 1], [], []>} : vector<8x4xf32>, vector<4x64xf32>, vector<8x64xf32> -> vector<8x64xf32>
    %62 = arith.addf %55, %61 : vector<8x64xf32>
    %c8 = arith.constant 8 : index
    %c0_63 = arith.constant 0 : index
    %c0_64 = arith.constant 0 : index
    %63 = vector.load %arg3[%c8, %c0_63, %c0_64] : memref<9x64x64xf32, #tpu.memory_space<vmem>>, vector<1x64x64xf32>
    %64 = vector.shape_cast %63 : vector<1x64x64xf32> to vector<64x64xf32>
    %cst_65 = arith.constant dense<0.000000e+00> : vector<4x64xf32>
    %65 = tpu.matmul %3, %64, %cst_65 {dimension_numbers = #tpu.dot_dimension_numbers<[1], [0], [0], [1], [0, 0, 1, 1], [], []>} : vector<4x64xf32>, vector<64x64xf32>, vector<4x64xf32> -> vector<4x64xf32>
    %c8_66 = arith.constant 8 : index
    %c0_67 = arith.constant 0 : index
    %c0_68 = arith.constant 0 : index
    %66 = vector.load %arg4[%c8_66, %c0_67, %c0_68] : memref<9x8x4xf32, #tpu.memory_space<vmem>>, vector<1x8x4xf32>
    %67 = vector.shape_cast %66 : vector<1x8x4xf32> to vector<8x4xf32>
    %cst_69 = arith.constant dense<0.000000e+00> : vector<8x64xf32>
    %68 = tpu.matmul %67, %65, %cst_69 {dimension_numbers = #tpu.dot_dimension_numbers<[1], [0], [0], [1], [0, 0, 1, 1], [], []>} : vector<8x4xf32>, vector<4x64xf32>, vector<8x64xf32> -> vector<8x64xf32>
    %69 = arith.addf %62, %68 : vector<8x64xf32>
    %cst_70 = arith.constant 0.000000e+00 : f32
    %70 = vector.broadcast %cst_70 : f32 to vector<8x64xf32>
    %71 = arith.cmpf ogt, %69, %70 : vector<8x64xf32>
    %cst_71 = arith.constant 2.000000e-01 : f32
    %72 = vector.broadcast %cst_71 : f32 to vector<8x64xf32>
    %73 = arith.mulf %72, %69 : vector<8x64xf32>
    %74 = arith.select %71, %69, %73 : vector<8x64xi1>, vector<8x64xf32>
    %c0_72 = arith.constant 0 : index
    %c0_73 = arith.constant 0 : index
    %75 = vector.load %arg8[%c0_72, %c0_73] : memref<8x1xf32, #tpu.memory_space<vmem>>, vector<8x1xf32>
    %76 = vector.shape_cast %75 : vector<8x1xf32> to vector<8x1xf32>
    %77 = vector.broadcast %76 : vector<8x1xf32> to vector<8x64xf32>
    %c0_74 = arith.constant 0 : index
    %c0_75 = arith.constant 0 : index
    %c0_76 = arith.constant 0 : index
    %78 = vector.load %arg6[%c0_74, %c0_75, %c0_76] : memref<9x64x64xf32, #tpu.memory_space<vmem>>, vector<1x64x64xf32>
    %79 = vector.shape_cast %78 : vector<1x64x64xf32> to vector<64x64xf32>
    %cst_77 = arith.constant dense<0.000000e+00> : vector<8x64xf32>
    %80 = tpu.matmul %74, %79, %cst_77 {dimension_numbers = #tpu.dot_dimension_numbers<[1], [0], [0], [1], [0, 0, 1, 1], [], []>} : vector<8x64xf32>, vector<64x64xf32>, vector<8x64xf32> -> vector<8x64xf32>
    %c0_78 = arith.constant 0 : index
    %c0_79 = arith.constant 0 : index
    %c0_80 = arith.constant 0 : index
    %81 = vector.load %arg7[%c0_78, %c0_79, %c0_80] : memref<9x8x8xf32, #tpu.memory_space<vmem>>, vector<1x8x8xf32>
    %82 = vector.shape_cast %81 : vector<1x8x8xf32> to vector<8x8xf32>
    %cst_81 = arith.constant dense<0.000000e+00> : vector<8x64xf32>
    %83 = tpu.matmul %82, %80, %cst_81 {dimension_numbers = #tpu.dot_dimension_numbers<[1], [0], [0], [1], [0, 0, 1, 1], [], []>} : vector<8x8xf32>, vector<8x64xf32>, vector<8x64xf32> -> vector<8x64xf32>
    %84 = arith.addf %77, %83 : vector<8x64xf32>
    %c1_82 = arith.constant 1 : index
    %c0_83 = arith.constant 0 : index
    %c0_84 = arith.constant 0 : index
    %85 = vector.load %arg6[%c1_82, %c0_83, %c0_84] : memref<9x64x64xf32, #tpu.memory_space<vmem>>, vector<1x64x64xf32>
    %86 = vector.shape_cast %85 : vector<1x64x64xf32> to vector<64x64xf32>
    %cst_85 = arith.constant dense<0.000000e+00> : vector<8x64xf32>
    %87 = tpu.matmul %74, %86, %cst_85 {dimension_numbers = #tpu.dot_dimension_numbers<[1], [0], [0], [1], [0, 0, 1, 1], [], []>} : vector<8x64xf32>, vector<64x64xf32>, vector<8x64xf32> -> vector<8x64xf32>
    %c1_86 = arith.constant 1 : index
    %c0_87 = arith.constant 0 : index
    %c0_88 = arith.constant 0 : index
    %88 = vector.load %arg7[%c1_86, %c0_87, %c0_88] : memref<9x8x8xf32, #tpu.memory_space<vmem>>, vector<1x8x8xf32>
    %89 = vector.shape_cast %88 : vector<1x8x8xf32> to vector<8x8xf32>
    %cst_89 = arith.constant dense<0.000000e+00> : vector<8x64xf32>
    %90 = tpu.matmul %89, %87, %cst_89 {dimension_numbers = #tpu.dot_dimension_numbers<[1], [0], [0], [1], [0, 0, 1, 1], [], []>} : vector<8x8xf32>, vector<8x64xf32>, vector<8x64xf32> -> vector<8x64xf32>
    %91 = arith.addf %84, %90 : vector<8x64xf32>
    %c2_90 = arith.constant 2 : index
    %c0_91 = arith.constant 0 : index
    %c0_92 = arith.constant 0 : index
    %92 = vector.load %arg6[%c2_90, %c0_91, %c0_92] : memref<9x64x64xf32, #tpu.memory_space<vmem>>, vector<1x64x64xf32>
    %93 = vector.shape_cast %92 : vector<1x64x64xf32> to vector<64x64xf32>
    %cst_93 = arith.constant dense<0.000000e+00> : vector<8x64xf32>
    %94 = tpu.matmul %74, %93, %cst_93 {dimension_numbers = #tpu.dot_dimension_numbers<[1], [0], [0], [1], [0, 0, 1, 1], [], []>} : vector<8x64xf32>, vector<64x64xf32>, vector<8x64xf32> -> vector<8x64xf32>
    %c2_94 = arith.constant 2 : index
    %c0_95 = arith.constant 0 : index
    %c0_96 = arith.constant 0 : index
    %95 = vector.load %arg7[%c2_94, %c0_95, %c0_96] : memref<9x8x8xf32, #tpu.memory_space<vmem>>, vector<1x8x8xf32>
    %96 = vector.shape_cast %95 : vector<1x8x8xf32> to vector<8x8xf32>
    %cst_97 = arith.constant dense<0.000000e+00> : vector<8x64xf32>
    %97 = tpu.matmul %96, %94, %cst_97 {dimension_numbers = #tpu.dot_dimension_numbers<[1], [0], [0], [1], [0, 0, 1, 1], [], []>} : vector<8x8xf32>, vector<8x64xf32>, vector<8x64xf32> -> vector<8x64xf32>
    %98 = arith.addf %91, %97 : vector<8x64xf32>
    %c3_98 = arith.constant 3 : index
    %c0_99 = arith.constant 0 : index
    %c0_100 = arith.constant 0 : index
    %99 = vector.load %arg6[%c3_98, %c0_99, %c0_100] : memref<9x64x64xf32, #tpu.memory_space<vmem>>, vector<1x64x64xf32>
    %100 = vector.shape_cast %99 : vector<1x64x64xf32> to vector<64x64xf32>
    %cst_101 = arith.constant dense<0.000000e+00> : vector<8x64xf32>
    %101 = tpu.matmul %74, %100, %cst_101 {dimension_numbers = #tpu.dot_dimension_numbers<[1], [0], [0], [1], [0, 0, 1, 1], [], []>} : vector<8x64xf32>, vector<64x64xf32>, vector<8x64xf32> -> vector<8x64xf32>
    %c3_102 = arith.constant 3 : index
    %c0_103 = arith.constant 0 : index
    %c0_104 = arith.constant 0 : index
    %102 = vector.load %arg7[%c3_102, %c0_103, %c0_104] : memref<9x8x8xf32, #tpu.memory_space<vmem>>, vector<1x8x8xf32>
    %103 = vector.shape_cast %102 : vector<1x8x8xf32> to vector<8x8xf32>
    %cst_105 = arith.constant dense<0.000000e+00> : vector<8x64xf32>
    %104 = tpu.matmul %103, %101, %cst_105 {dimension_numbers = #tpu.dot_dimension_numbers<[1], [0], [0], [1], [0, 0, 1, 1], [], []>} : vector<8x8xf32>, vector<8x64xf32>, vector<8x64xf32> -> vector<8x64xf32>
    %105 = arith.addf %98, %104 : vector<8x64xf32>
    %c4_106 = arith.constant 4 : index
    %c0_107 = arith.constant 0 : index
    %c0_108 = arith.constant 0 : index
    %106 = vector.load %arg6[%c4_106, %c0_107, %c0_108] : memref<9x64x64xf32, #tpu.memory_space<vmem>>, vector<1x64x64xf32>
    %107 = vector.shape_cast %106 : vector<1x64x64xf32> to vector<64x64xf32>
    %cst_109 = arith.constant dense<0.000000e+00> : vector<8x64xf32>
    %108 = tpu.matmul %74, %107, %cst_109 {dimension_numbers = #tpu.dot_dimension_numbers<[1], [0], [0], [1], [0, 0, 1, 1], [], []>} : vector<8x64xf32>, vector<64x64xf32>, vector<8x64xf32> -> vector<8x64xf32>
    %c4_110 = arith.constant 4 : index
    %c0_111 = arith.constant 0 : index
    %c0_112 = arith.constant 0 : index
    %109 = vector.load %arg7[%c4_110, %c0_111, %c0_112] : memref<9x8x8xf32, #tpu.memory_space<vmem>>, vector<1x8x8xf32>
    %110 = vector.shape_cast %109 : vector<1x8x8xf32> to vector<8x8xf32>
    %cst_113 = arith.constant dense<0.000000e+00> : vector<8x64xf32>
    %111 = tpu.matmul %110, %108, %cst_113 {dimension_numbers = #tpu.dot_dimension_numbers<[1], [0], [0], [1], [0, 0, 1, 1], [], []>} : vector<8x8xf32>, vector<8x64xf32>, vector<8x64xf32> -> vector<8x64xf32>
    %112 = arith.addf %105, %111 : vector<8x64xf32>
    %c5_114 = arith.constant 5 : index
    %c0_115 = arith.constant 0 : index
    %c0_116 = arith.constant 0 : index
    %113 = vector.load %arg6[%c5_114, %c0_115, %c0_116] : memref<9x64x64xf32, #tpu.memory_space<vmem>>, vector<1x64x64xf32>
    %114 = vector.shape_cast %113 : vector<1x64x64xf32> to vector<64x64xf32>
    %cst_117 = arith.constant dense<0.000000e+00> : vector<8x64xf32>
    %115 = tpu.matmul %74, %114, %cst_117 {dimension_numbers = #tpu.dot_dimension_numbers<[1], [0], [0], [1], [0, 0, 1, 1], [], []>} : vector<8x64xf32>, vector<64x64xf32>, vector<8x64xf32> -> vector<8x64xf32>
    %c5_118 = arith.constant 5 : index
    %c0_119 = arith.constant 0 : index
    %c0_120 = arith.constant 0 : index
    %116 = vector.load %arg7[%c5_118, %c0_119, %c0_120] : memref<9x8x8xf32, #tpu.memory_space<vmem>>, vector<1x8x8xf32>
    %117 = vector.shape_cast %116 : vector<1x8x8xf32> to vector<8x8xf32>
    %cst_121 = arith.constant dense<0.000000e+00> : vector<8x64xf32>
    %118 = tpu.matmul %117, %115, %cst_121 {dimension_numbers = #tpu.dot_dimension_numbers<[1], [0], [0], [1], [0, 0, 1, 1], [], []>} : vector<8x8xf32>, vector<8x64xf32>, vector<8x64xf32> -> vector<8x64xf32>
    %119 = arith.addf %112, %118 : vector<8x64xf32>
    %c6_122 = arith.constant 6 : index
    %c0_123 = arith.constant 0 : index
    %c0_124 = arith.constant 0 : index
    %120 = vector.load %arg6[%c6_122, %c0_123, %c0_124] : memref<9x64x64xf32, #tpu.memory_space<vmem>>, vector<1x64x64xf32>
    %121 = vector.shape_cast %120 : vector<1x64x64xf32> to vector<64x64xf32>
    %cst_125 = arith.constant dense<0.000000e+00> : vector<8x64xf32>
    %122 = tpu.matmul %74, %121, %cst_125 {dimension_numbers = #tpu.dot_dimension_numbers<[1], [0], [0], [1], [0, 0, 1, 1], [], []>} : vector<8x64xf32>, vector<64x64xf32>, vector<8x64xf32> -> vector<8x64xf32>
    %c6_126 = arith.constant 6 : index
    %c0_127 = arith.constant 0 : index
    %c0_128 = arith.constant 0 : index
    %123 = vector.load %arg7[%c6_126, %c0_127, %c0_128] : memref<9x8x8xf32, #tpu.memory_space<vmem>>, vector<1x8x8xf32>
    %124 = vector.shape_cast %123 : vector<1x8x8xf32> to vector<8x8xf32>
    %cst_129 = arith.constant dense<0.000000e+00> : vector<8x64xf32>
    %125 = tpu.matmul %124, %122, %cst_129 {dimension_numbers = #tpu.dot_dimension_numbers<[1], [0], [0], [1], [0, 0, 1, 1], [], []>} : vector<8x8xf32>, vector<8x64xf32>, vector<8x64xf32> -> vector<8x64xf32>
    %126 = arith.addf %119, %125 : vector<8x64xf32>
    %c7_130 = arith.constant 7 : index
    %c0_131 = arith.constant 0 : index
    %c0_132 = arith.constant 0 : index
    %127 = vector.load %arg6[%c7_130, %c0_131, %c0_132] : memref<9x64x64xf32, #tpu.memory_space<vmem>>, vector<1x64x64xf32>
    %128 = vector.shape_cast %127 : vector<1x64x64xf32> to vector<64x64xf32>
    %cst_133 = arith.constant dense<0.000000e+00> : vector<8x64xf32>
    %129 = tpu.matmul %74, %128, %cst_133 {dimension_numbers = #tpu.dot_dimension_numbers<[1], [0], [0], [1], [0, 0, 1, 1], [], []>} : vector<8x64xf32>, vector<64x64xf32>, vector<8x64xf32> -> vector<8x64xf32>
    %c7_134 = arith.constant 7 : index
    %c0_135 = arith.constant 0 : index
    %c0_136 = arith.constant 0 : index
    %130 = vector.load %arg7[%c7_134, %c0_135, %c0_136] : memref<9x8x8xf32, #tpu.memory_space<vmem>>, vector<1x8x8xf32>
    %131 = vector.shape_cast %130 : vector<1x8x8xf32> to vector<8x8xf32>
    %cst_137 = arith.constant dense<0.000000e+00> : vector<8x64xf32>
    %132 = tpu.matmul %131, %129, %cst_137 {dimension_numbers = #tpu.dot_dimension_numbers<[1], [0], [0], [1], [0, 0, 1, 1], [], []>} : vector<8x8xf32>, vector<8x64xf32>, vector<8x64xf32> -> vector<8x64xf32>
    %133 = arith.addf %126, %132 : vector<8x64xf32>
    %c8_138 = arith.constant 8 : index
    %c0_139 = arith.constant 0 : index
    %c0_140 = arith.constant 0 : index
    %134 = vector.load %arg6[%c8_138, %c0_139, %c0_140] : memref<9x64x64xf32, #tpu.memory_space<vmem>>, vector<1x64x64xf32>
    %135 = vector.shape_cast %134 : vector<1x64x64xf32> to vector<64x64xf32>
    %cst_141 = arith.constant dense<0.000000e+00> : vector<8x64xf32>
    %136 = tpu.matmul %74, %135, %cst_141 {dimension_numbers = #tpu.dot_dimension_numbers<[1], [0], [0], [1], [0, 0, 1, 1], [], []>} : vector<8x64xf32>, vector<64x64xf32>, vector<8x64xf32> -> vector<8x64xf32>
    %c8_142 = arith.constant 8 : index
    %c0_143 = arith.constant 0 : index
    %c0_144 = arith.constant 0 : index
    %137 = vector.load %arg7[%c8_142, %c0_143, %c0_144] : memref<9x8x8xf32, #tpu.memory_space<vmem>>, vector<1x8x8xf32>
    %138 = vector.shape_cast %137 : vector<1x8x8xf32> to vector<8x8xf32>
    %cst_145 = arith.constant dense<0.000000e+00> : vector<8x64xf32>
    %139 = tpu.matmul %138, %136, %cst_145 {dimension_numbers = #tpu.dot_dimension_numbers<[1], [0], [0], [1], [0, 0, 1, 1], [], []>} : vector<8x8xf32>, vector<8x64xf32>, vector<8x64xf32> -> vector<8x64xf32>
    %140 = arith.addf %133, %139 : vector<8x64xf32>
    %cst_146 = arith.constant 0.000000e+00 : f32
    %141 = vector.broadcast %cst_146 : f32 to vector<8x64xf32>
    %142 = arith.cmpf ogt, %140, %141 : vector<8x64xf32>
    %cst_147 = arith.constant 2.000000e-01 : f32
    %143 = vector.broadcast %cst_147 : f32 to vector<8x64xf32>
    %144 = arith.mulf %143, %140 : vector<8x64xf32>
    %145 = arith.select %142, %140, %144 : vector<8x64xi1>, vector<8x64xf32>
    %c0_148 = arith.constant 0 : index
    %c0_149 = arith.constant 0 : index
    %c0_150 = arith.constant 0 : index
    %146 = vector.load %arg9[%c0_148, %c0_149, %c0_150] : memref<1x8x64xf32, #tpu.memory_space<vmem>>, vector<1x8x64xf32>
    %147 = vector.shape_cast %146 : vector<1x8x64xf32> to vector<8x64xf32>
    %148 = vector.shape_cast %145 : vector<8x64xf32> to vector<1x8x64xf32>
    tpu.vector_store %arg9[%c0_148, %c0_149, %c0_150], %148 {strides = array<i32>} : memref<1x8x64xf32, #tpu.memory_space<vmem>>, vector<1x8x64xf32>,
    return
  }
  func.func @transform_0(%arg0: i32) -> (i32, i32, i32) {
    %c0_i32 = arith.constant 0 : i32
    %c0_i32_0 = arith.constant 0 : i32
    %c0_i32_1 = arith.constant 0 : i32
    return %arg0, %c0_i32, %c0_i32_0 : i32, i32, i32
  }
  func.func @transform_1(%arg0: i32) -> (i32, i32) {
    %c0_i32 = arith.constant 0 : i32
    %c0_i32_0 = arith.constant 0 : i32
    %c0_i32_1 = arith.constant 0 : i32
    return %c0_i32, %c0_i32_0 : i32, i32
  }
  func.func @transform_2(%arg0: i32) -> (i32, i32, i32) {
    %c0_i32 = arith.constant 0 : i32
    %c0_i32_0 = arith.constant 0 : i32
    %c0_i32_1 = arith.constant 0 : i32
    %c0_i32_2 = arith.constant 0 : i32
    return %c0_i32, %c0_i32_0, %c0_i32_1 : i32, i32, i32
  }
  func.func @transform_3(%arg0: i32) -> (i32, i32, i32) {
    %c0_i32 = arith.constant 0 : i32
    %c0_i32_0 = arith.constant 0 : i32
    %c0_i32_1 = arith.constant 0 : i32
    %c0_i32_2 = arith.constant 0 : i32
    return %c0_i32, %c0_i32_0, %c0_i32_1 : i32, i32, i32
  }
  func.func @transform_4(%arg0: i32) -> (i32, i32) {
    %c0_i32 = arith.constant 0 : i32
    %c0_i32_0 = arith.constant 0 : i32
    %c0_i32_1 = arith.constant 0 : i32
    return %c0_i32, %c0_i32_0 : i32, i32
  }
  func.func @transform_5(%arg0: i32) -> (i32, i32, i32) {
    %c0_i32 = arith.constant 0 : i32
    %c0_i32_0 = arith.constant 0 : i32
    %c0_i32_1 = arith.constant 0 : i32
    %c0_i32_2 = arith.constant 0 : i32
    return %c0_i32, %c0_i32_0, %c0_i32_1 : i32, i32, i32
  }
  func.func @transform_6(%arg0: i32) -> (i32, i32, i32) {
    %c0_i32 = arith.constant 0 : i32
    %c0_i32_0 = arith.constant 0 : i32
    %c0_i32_1 = arith.constant 0 : i32
    %c0_i32_2 = arith.constant 0 : i32
    return %c0_i32, %c0_i32_0, %c0_i32_1 : i32, i32, i32
  }
  func.func @transform_7(%arg0: i32) -> (i32, i32) {
    %c0_i32 = arith.constant 0 : i32
    %c0_i32_0 = arith.constant 0 : i32
    %c0_i32_1 = arith.constant 0 : i32
    return %c0_i32, %c0_i32_0 : i32, i32
  }
  func.func @transform_8(%arg0: i32) -> (i32, i32, i32) {
    %c0_i32 = arith.constant 0 : i32
    %c0_i32_0 = arith.constant 0 : i32
    %c0_i32_1 = arith.constant 0 : i32
    return %arg0, %c0_i32, %c0_i32_0 : i32, i32, i32
  }
}

</mosaic_0001>

<bundles_post_ra>
// kernel: dis_block_forward.1
= control target key start
LH: loop header
LB: loop body
LE: loop exit
PB: predicated region body
PF: predicated region fallthrough
CT: control target
= control target key end

     0   :  { %13 = vsyncpa [#allocation3], 0  ;;  %s5100_s0 = inlined_call_operand.vmem [shape: f32[2,4,256], index: 0, kind: input, shape index: {}]   ;;  %s5101_s1 = inlined_call_operand.vmem [shape: f32[256,64], index: 1, kind: input, shape index: {}]   ;;  %s5102_s2 = inlined_call_operand.hbm [shape: f32[9,64,64], index: 2, kind: input, shape index: {}, may-alias: {2,5}]   ;;  %s5103_s3 = inlined_call_operand.vmem [shape: f32[9,8,4], index: 3, kind: input, shape index: {}]   ;;  %s5104_s4 = inlined_call_operand.vmem [shape: f32[8,1], index: 4, kind: input, shape index: {}]   ;;  %s5105_s5 = inlined_call_operand.hbm [shape: f32[9,64,64], index: 5, kind: input, shape index: {}, may-alias: {2,5}]   ;;  %s5106_s6 = inlined_call_operand.hbm [shape: f32[9,8,8], index: 6, kind: input, shape index: {}]   ;;  %s5107_s7 = inlined_call_operand.vmem [shape: f32[8,1], index: 7, kind: input, shape index: {}]   ;;  %s5108_s8 = inlined_call_operand.vmem [shape: f32[2,8,64], index: 8, kind: output, shape index: {}]  }
   0x1   :  { %14 = vsyncpa [#allocation5], 0  ;;  %s4598_s27 = smov 0  }
   0x2 LB: > { %s4604_s28 = sadd.s32 4294967295, %s4542_s27   ;;  %p3382_p0 = scmp.ge.s32.totalorder %s4542_s27, 1  ;;  %s4542_s27 = sphi %s4598_s27, %s20_s27  }
   0x3   : > { %p224_p1 = scmp.lt.s32.totalorder %s4542_s27, 3  ;;  %p5109_p2 = scmp.eq.s32.totalorder %s4604_s28, 0 }
   0x4   : > { %s4544_s30 = smov [#allocation4]   ;;  %s4545_s10 = smov [#allocation2]  }
   0x5   : > { %p4609_p3 = pnand %p3382_p0, %p224_p1  ;;  %s258_s9 = sshll.u32 %s4544_s30, 4  ;;  %s259_s9 = int_to_ptr.vmem [resolvable:$true] %s258_s9 }
   0x6   : > { %s239_s11 = sshll.u32 %s4545_s10, 4  ;;  %s4546_s13 = smov [#allocation6]   ;;  %s4621_s11 = int_to_ptr.vmem [resolvable:$true] %s239_s11 }
   0x7   : > { %s5111_s29 = scalar_select %p4609_p3, 1, 0 }
   0x8   : > { %p4409_p4 = pneg %p4609_p3  ;;  %s271_s14 = sshll.u32 %s4546_s13, 4  ;;  %s4623_s14 = int_to_ptr.vmem [resolvable:$true] %s271_s14 }
   0x9   : > { %s4444_s17 = scalar_lea.hbm %s5105_s5, 9216 }
   0xa   : > { %p4617_p5 = pnand %p5109_p2, %p4409_p4  ;;  %p4445_p6 = scmp.ne.s32.totalorder %s5105_s5, %s4444_s17 }
   0xb   : > { %p4451_p10 = scmp.lt.u32.totalorder %s4444_s17, %s5105_s5 }
   0xc   : > { %p4633_p7 = pneg %p4617_p5 }
   0xe   : > { %p4447_p8 = pnand %p4633_p7, %p4445_p6 }
  0x10   : > { %p4448_p9 = pneg %p4447_p8 }
  0x12   : > { %p4453_p11 = pnand %p4451_p10, %p4448_p9 }
  0x14   : > { %4456 = shalt.err (!%p4453_p11)
}
  0x15   : > { %s4457_s23 = scalar_lea.vmem %s259_s9, 9216  ;;  %p4465_p1 = scmp.lt.s32.totalorder %s259_s9, %s259_s9 }
  0x16   : > { %p4458_p12 = scmp.ne.s32.totalorder %s259_s9, %s4457_s23  ;;  %p4466_p4 = scmp.lt.s32.totalorder %s4457_s23, %s4457_s23 }
  0x18   : > { %p4460_p13 = pnand %p4458_p12, %p4633_p7  ;;  %p4467_p2 = por %p4466_p4, %p4465_p1 }
  0x1a   : > { %p4461_p0 = pneg %p4460_p13 }
  0x1c   : > { %p4468_p3 = pnand %p4467_p2, %p4461_p0 }
  0x1e   : > { %4471 = shalt.err (!%p4468_p3)
}
  0x1f   : > { %s4547_s24 = smov 128   ;;  %s4548_s25 = smov 8  }
  0x20   : > { %4415 = dma.hbm_to_vmem [thread:$0]  (!%p4617_p5), %s5105_s5, 9216, %s259_s9, [#allocation5], %s4547_s24, %s4547_s24, %s4548_s25  }
  0x21   : > { %s4472_s15 = scalar_lea.hbm %s5102_s2, 9216 }
  0x22   : > { %p4473_p2 = scmp.ne.s32.totalorder %s5102_s2, %s4472_s15  ;;  %p4479_p8 = scmp.lt.u32.totalorder %s4472_s15, %s5102_s2 }
  0x24   : > { %p4475_p3 = pnand %p4473_p2, %p4633_p7 }
  0x26   : > { %p4476_p6 = pneg %p4475_p3 }
  0x28   : > { %p4481_p9 = pnand %p4479_p8, %p4476_p6 }
  0x2a   : > { %4484 = shalt.err (!%p4481_p9)
}
  0x2b   : > { %s4485_s9 = scalar_lea.vmem %s4621_s11, 9216  ;;  %p4493_p13 = scmp.lt.s32.totalorder %s4621_s11, %s4621_s11 }
  0x2c   : > { %p4486_p10 = scmp.ne.s32.totalorder %s4621_s11, %s4485_s9  ;;  %p4494_p0 = scmp.lt.s32.totalorder %s4485_s9, %s4485_s9 }
  0x2e   : > { %p4488_p11 = pnand %p4486_p10, %p4633_p7  ;;  %p4495_p1 = por %p4494_p0, %p4493_p13 }
  0x30   : > { %p4489_p12 = pneg %p4488_p11 }
  0x32   : > { %p4496_p4 = pnand %p4495_p1, %p4489_p12 }
  0x34   : > { %4499 = shalt.err (!%p4496_p4)
}
  0x35   : > { %4412 = dma.hbm_to_vmem [thread:$0]  (!%p4617_p5), %s5102_s2, 9216, %s4621_s11, [#allocation3], %s4547_s24, %s4547_s24, %s4548_s25  }
  0x36   : > { %s4500_s30 = scalar_lea.hbm %s5106_s6, 1152 }
  0x37   : > { %p4501_p2 = scmp.ne.s32.totalorder %s5106_s6, %s4500_s30  ;;  %p4507_p8 = scmp.lt.u32.totalorder %s4500_s30, %s5106_s6 }
  0x39   : > { %p4503_p3 = pnand %p4501_p2, %p4633_p7 }
  0x3b   : > { %p4504_p6 = pneg %p4503_p3 }
  0x3d   : > { %p4509_p9 = pnand %p4507_p8, %p4504_p6 }
  0x3f   : > { %4512 = shalt.err (!%p4509_p9)
}
  0x40   : > { %s4513_s11 = scalar_lea.vmem %s4623_s14, 1152  ;;  %p4521_p13 = scmp.lt.s32.totalorder %s4623_s14, %s4623_s14 }
  0x41   : > { %p4514_p10 = scmp.ne.s32.totalorder %s4623_s14, %s4513_s11  ;;  %p4522_p0 = scmp.lt.s32.totalorder %s4513_s11, %s4513_s11 }
  0x43   : > { %p4516_p11 = pnand %p4514_p10, %p4633_p7  ;;  %p4523_p1 = por %p4522_p0, %p4521_p13 }
  0x45   : > { %p4517_p12 = pneg %p4516_p11 }
  0x47   : > { %p4524_p4 = pnand %p4523_p1, %p4517_p12 }
  0x49   : > { %4527 = shalt.err (!%p4524_p4)
}
  0x4a   : > { %4418 = dma.hbm_to_vmem [thread:$0]  (!%p4617_p5), %s5106_s6, 1152, %s4623_s14, [#allocation5], %s4547_s24, %s4547_s24, %s4548_s25  }
  0x4b   : > { %p5114_p2 = scmp.ne.s32.totalorder %s5111_s29, 0 }
  0x4c   : > { %p5115_p7 = scmp.eq.s32.totalorder (!%p5114_p2), %s4604_s28, 0 }
  0x4d   : > { %298 = sbr.rel (%p5114_p2) target bundleno = 2654 (0xa5e), region = 52 }
  0x54   : > { %4533 = dma.done.wait (%p5115_p7), [#allocation3], 9216   ;;  %p5116_p3 = pmov %p5115_p7 }
  0x56   : > { %4535 = vsyncadd (%p5116_p3), [#allocation3], 4294958080  ;;  %p5117_p6 = pmov %p5116_p3 }
  0x57   : > { %p5118_p8 = pmov %p5116_p3 }
  0x58   : > { %4537 = dma.done.wait (%p5117_p6), [#allocation5], 10368  }
  0x59   : > { %4539 = vsyncadd (%p5118_p8), [#allocation5], 4294956928  ;;  %v4549_v0 = vmov 0.0|0.0   ;;  %p339_p5 = scmp.lt.s32.totalorder %s4604_s28, 1  ;;  %v365_v1 = vld [vmem:[%s5101_s1 + $0x80] sm:$0xff]  ;;  %v366_v2 = vld [vmem:[%s5101_s1 + $0x88] sm:$0xff] }
  0x5a   : > { %4147 = vmatprep.subr.bf16.mxu1 %v4549_v0  ;;  %v349_v3 = vld [vmem:[%s5101_s1] sm:$0xff]  ;;  %v4115_v4 = vpack.c.bf16 %v366_v2, %v365_v1  ;;  %v350_v5 = vld [vmem:[%s5101_s1 + $0x8] sm:$0xff]  ;;  %v367_v6 = vld [vmem:[%s5101_s1 + $0x90] sm:$0xff]  ;;  %vm4550_vm0 = vmmov 0   ;;  %vm468_vm1 = vcmask 523264   ;;  %vm547_vm2 = vcmask 1043456  }
  0x5b   : > { %s5120_s28 = smov (!%p339_p5, %s4604_s28), 1  ;;  %v368_v7 = vld [vmem:[%s5101_s1 + $0x98] sm:$0xff]  ;;  %v4117_v8 = vpack.c.bf16 %v350_v5, %v349_v3  ;;  %v351_v10 = vld [vmem:[%s5101_s1 + $0x10] sm:$0xff]  ;;  %v369_v12 = vld [vmem:[%s5101_s1 + $0xa0] sm:$0xff]  ;;  %vm543_vm3 = vcmask 31744   ;;  %vm1977_vm5 = vcmask 64512  }
  0x5c   : > { %v4119_v9 = vpack.c.bf16 %v368_v7, %v367_v6  ;;  %v352_v11 = vld [vmem:[%s5101_s1 + $0x18] sm:$0xff]  ;;  %4116 = vmatprep.subr.bf16.mxu0 %v4115_v4  ;;  %v370_v13 = vld [vmem:[%s5101_s1 + $0xa8] sm:$0xff]  ;;  %s3449_s29 = sshll.u32 %s5120_s28, 3  ;;  %v353_v16 = vld [vmem:[%s5101_s1 + $0x20] sm:$0xff] }
  0x5d   : > { %4118 = vmatpush3.bf16.msra.mxu0 %v4117_v8  ;;  %v4121_v14 = vpack.c.bf16 %v352_v11, %v351_v10  ;;  %v4123_v15 = vpack.c.bf16 %v370_v13, %v369_v12  ;;  %v354_v17 = vld [vmem:[%s5101_s1 + $0x28] sm:$0xff]  ;;  %v371_v18 = vld [vmem:[%s5101_s1 + $0xb0] sm:$0xff]  ;;  %v372_v19 = vld [vmem:[%s5101_s1 + $0xb8] sm:$0xff]  ;;  %s343_s26 = scalar_lea.vmem %s5100_s0, %s3449_s29  ;;  %v4551_v12 = vmov 0.0   ;;  %s347_s15 = scalar_lea.vmem %s5108_s8, %s3449_s29 }
  0x5e   : > { %4120 = vmatprep.subr.bf16.mxu0 %v4119_v9  ;;  %v4125_v20 = vpack.c.bf16 %v354_v17, %v353_v16  ;;  %v4127_v21 = vpack.c.bf16 %v372_v19, %v371_v18  ;;  %v355_v22 = vld [vmem:[%s5101_s1 + $0x30] sm:$0xff]  ;;  %v356_v23 = vld [vmem:[%s5101_s1 + $0x38] sm:$0xff]  ;;  %v373_v24 = vld [vmem:[%s5101_s1 + $0xc0] sm:$0xff]  ;;  %3699 = vmatprep.mubr.msk.f32.mxu1 %vm4550_vm0, %v4551_v12 }
  0x5f   : > { %v374_v25 = vld [vmem:[%s5101_s1 + $0xc8] sm:$0xff]  ;;  %v348_v26 = vld [vmem:[%s343_s26] sm:$0xff]  ;;  %v4129_v29 = vpack.c.bf16 %v356_v23, %v355_v22  ;;  %v462_v35 = vld [vmem:[#allocation2 + $0x10] sm:$0xff] }
  0x60   : > { %v382_v27 = vcombine.high %v348_v26, %v348_v26  ;;  %v460_v28 = vld [vmem:[#allocation2] sm:$0xff]  ;;  %v461_v31 = vld [vmem:[#allocation2 + $0x8] sm:$0xff]  ;;  %v4131_v32 = vpack.c.bf16 %v374_v25, %v373_v24  ;;  %v463_v36 = vld [vmem:[#allocation2 + $0x18] sm:$0xff] }
  0x61   : > { %4122 = vmatpush3.bf16.msra.mxu0 %v4121_v14  ;;  %v357_v30 = vld [vmem:[%s5101_s1 + $0x40] sm:$0xff]  ;;  %v358_v33 = vld [vmem:[%s5101_s1 + $0x48] sm:$0xff]  ;;  %v4148_v34 = vpack.c.bf16 %v461_v31, %v460_v28  ;;  %v375_v37 = vld [vmem:[%s5101_s1 + $0xd0] sm:$0xff]  ;;  %v4151_v39 = vpack.c.bf16 %v463_v36, %v462_v35 }
  0x62   : > { %4124 = vmatprep.subr.bf16.mxu0 %v4123_v15  ;;  %448 = vmatprep.mubr.f32.mxu0 %v382_v27  ;;  %v376_v38 = vld [vmem:[%s5101_s1 + $0xd8] sm:$0xff]  ;;  %v4133_v40 = vpack.c.bf16 %v358_v33, %v357_v30  ;;  %v464_v41 = vld [vmem:[#allocation2 + $0x20] sm:$0xff]  ;;  %v465_v42 = vld [vmem:[#allocation2 + $0x28] sm:$0xff] }
  0x63   : > { %4149 = vmatpush3.bf16.msra.mxu1 %v4148_v34  ;;  %v4135_v43 = vpack.c.bf16 %v376_v38, %v375_v37  ;;  %v359_v44 = vld [vmem:[%s5101_s1 + $0x50] sm:$0xff]  ;;  %v360_v45 = vld [vmem:[%s5101_s1 + $0x58] sm:$0xff]  ;;  %v377_v46 = vld [vmem:[%s5101_s1 + $0xe0] sm:$0xff]  ;;  %v4154_v48 = vpack.c.bf16 %v465_v42, %v464_v41 }
  0x64   : > { %4150 = vmatprep.subr.bf16.mxu1 %v4549_v0  ;;  %v378_v47 = vld [vmem:[%s5101_s1 + $0xe8] sm:$0xff]  ;;  %v4137_v49 = vpack.c.bf16 %v360_v45, %v359_v44  ;;  %v361_v51 = vld [vmem:[%s5101_s1 + $0x60] sm:$0xff]  ;;  %v379_v53 = vld [vmem:[%s5101_s1 + $0xf0] sm:$0xff] }
  0x65   : > { %4126 = vmatpush3.bf16.msra.mxu0 %v4125_v20  ;;  %v4139_v50 = vpack.c.bf16 %v378_v47, %v377_v46  ;;  %v362_v52 = vld [vmem:[%s5101_s1 + $0x68] sm:$0xff]  ;;  %v380_v54 = vld [vmem:[%s5101_s1 + $0xf8] sm:$0xff]  ;;  %v363_v57 = vld [vmem:[%s5101_s1 + $0x70] sm:$0xff] }
  0x66   : > { %4128 = vmatprep.subr.bf16.mxu0 %v4127_v21  ;;  %v4141_v55 = vpack.c.bf16 %v362_v52, %v361_v51  ;;  %v4143_v56 = vpack.c.bf16 %v380_v54, %v379_v53  ;;  %v364_v58 = vld [vmem:[%s5101_s1 + $0x78] sm:$0xff]  ;;  %v781_v60 = vld [vmem:[#allocation2 + $0x80] sm:$0xff]  ;;  %v782_v61 = vld [vmem:[#allocation2 + $0x88] sm:$0xff] }
  0x67   : > { %4152 = vmatpush3.bf16.msra.mxu1 %v4151_v39  ;;  %v4145_v59 = vpack.c.bf16 %v364_v58, %v363_v57  ;;  %v4172_v62 = vpack.c.bf16 %v782_v61, %v781_v60  ;;  %v783_v63 = vld [vmem:[#allocation2 + $0x90] sm:$0xff]  ;;  %v784_v1 = vld [vmem:[#allocation2 + $0x98] sm:$0xff]  ;;  %v785_v3 = vld [vmem:[#allocation2 + $0xa0] sm:$0xff] }
  0x68   : > { %4153 = vmatprep.subr.bf16.mxu1 %v4549_v0  ;;  %v4175_v2 = vpack.c.bf16 %v784_v1, %v783_v63  ;;  %v786_v4 = vld [vmem:[#allocation2 + $0xa8] sm:$0xff]  ;;  %v787_v6 = vld [vmem:[#allocation2 + $0xb0] sm:$0xff]  ;;  %v788_v7 = vld [vmem:[#allocation2 + $0xb8] sm:$0xff] }
  0x69   : > { %4130 = vmatpush3.bf16.msra.mxu0 %v4129_v29  ;;  %v4178_v5 = vpack.c.bf16 %v786_v4, %v785_v3  ;;  %v4181_v8 = vpack.c.bf16 %v788_v7, %v787_v6  ;;  %v466_v9 = vld [vmem:[#allocation2 + $0x30] sm:$0xff]  ;;  %v467_v10 = vld [vmem:[#allocation2 + $0x38] sm:$0xff]  ;;  %v1097_v13 = vld [vmem:[#allocation2 + $0x100] sm:$0xff] }
  0x6a   : > { %4132 = vmatprep.subr.bf16.mxu0 %v4131_v32  ;;  %v4157_v11 = vpack.c.bf16 %v467_v10, %v466_v9  ;;  %v1098_v14 = vld [vmem:[#allocation2 + $0x108] sm:$0xff]  ;;  %v1099_v19 = vld [vmem:[#allocation2 + $0x110] sm:$0xff]  ;;  %v1100_v20 = vld [vmem:[#allocation2 + $0x118] sm:$0xff] }
  0x6b   : > { %4155 = vmatpush3.bf16.msra.mxu1 %v4154_v48  ;;  %v4196_v17 = vpack.c.bf16 %v1098_v14, %v1097_v13  ;;  %v4199_v21 = vpack.c.bf16 %v1100_v20, %v1099_v19  ;;  %v1101_v22 = vld [vmem:[#allocation2 + $0x120] sm:$0xff]  ;;  %v1102_v23 = vld [vmem:[#allocation2 + $0x128] sm:$0xff]  ;;  %v1103_v25 = vld [vmem:[#allocation2 + $0x130] sm:$0xff] }
  0x6c   : > { %4156 = vmatprep.subr.bf16.mxu1 %v4549_v0  ;;  %v4202_v24 = vpack.c.bf16 %v1102_v23, %v1101_v22  ;;  %v1255_v28 = vld [vmem:[#allocation2 + $0x140] sm:$0xff]  ;;  %v1256_v29 = vld [vmem:[#allocation2 + $0x148] sm:$0xff]  ;;  %v1257_v31 = vld [vmem:[#allocation2 + $0x150] sm:$0xff] }
  0x6d   : > { %4134 = vmatpush3.bf16.msra.mxu0 %v4133_v40  ;;  %v4208_v30 = vpack.c.bf16 %v1256_v29, %v1255_v28  ;;  %v1258_v32 = vld [vmem:[#allocation2 + $0x158] sm:$0xff]  ;;  %v1259_v34 = vld [vmem:[#allocation2 + $0x160] sm:$0xff]  ;;  %v1260_v35 = vld [vmem:[#allocation2 + $0x168] sm:$0xff] }
  0x6e   : > { %4136 = vmatprep.subr.bf16.mxu0 %v4135_v43  ;;  %v4211_v33 = vpack.c.bf16 %v1258_v32, %v1257_v31  ;;  %v4214_v36 = vpack.c.bf16 %v1260_v35, %v1259_v34  ;;  %v1261_v37 = vld [vmem:[#allocation2 + $0x170] sm:$0xff]  ;;  %v1262_v38 = vld [vmem:[#allocation2 + $0x178] sm:$0xff]  ;;  %v1571_v40 = vld [vmem:[#allocation2 + $0x1c0] sm:$0xff] }
  0x6f   : > { %4158 = vmatpush3.bf16.msra.mxu1 %v4157_v11  ;;  %v4217_v39 = vpack.c.bf16 %v1262_v38, %v1261_v37  ;;  %v1572_v41 = vld [vmem:[#allocation2 + $0x1c8] sm:$0xff]  ;;  %v1573_v43 = vld [vmem:[#allocation2 + $0x1d0] sm:$0xff]  ;;  %v1574_v44 = vld [vmem:[#allocation2 + $0x1d8] sm:$0xff] }
  0x70   : > { %3702 = vmatprep.subr.mxu1 %v4551_v12  ;;  %v4232_v42 = vpack.c.bf16 %v1572_v41, %v1571_v40  ;;  %v4235_v45 = vpack.c.bf16 %v1574_v44, %v1573_v43  ;;  %v1575_v46 = vld [vmem:[#allocation2 + $0x1e0] sm:$0xff]  ;;  %v1576_v47 = vld [vmem:[#allocation2 + $0x1e8] sm:$0xff]  ;;  %v1735_v61 = vld [vmem:[#allocation2 + $0x230] sm:$0xff] }
  0x71   : > { %4138 = vmatpush3.bf16.msra.mxu0 %v4137_v49  ;;  %v4238_v48 = vpack.c.bf16 %v1576_v47, %v1575_v46  ;;  %v1577_v49 = vld [vmem:[#allocation2 + $0x1f0] sm:$0xff]  ;;  %v1729_v52 = vld [vmem:[#allocation2 + $0x200] sm:$0xff]  ;;  %v1730_v53 = vld [vmem:[#allocation2 + $0x208] sm:$0xff] }
  0x72   : > { %4140 = vmatprep.subr.bf16.mxu0 %v4139_v50  ;;  %v1578_v50 = vld [vmem:[#allocation2 + $0x1f8] sm:$0xff]  ;;  %v4244_v54 = vpack.c.bf16 %v1730_v53, %v1729_v52  ;;  %v1733_v58 = vld [vmem:[#allocation2 + $0x220] sm:$0xff]  ;;  %v625_v7 = vld [vmem:[#allocation2 + $0x50] sm:$0xff] }
  0x73   : > { %v4241_v51 = vpack.c.bf16 %v1578_v50, %v1577_v49  ;;  %v623_v1 = vld [vmem:[#allocation2 + $0x40] sm:$0xff]  ;;  %v628_v14 = vld [vmem:[#allocation2 + $0x68] sm:$0xff]  ;;  %v941_v35 = vld [vmem:[#allocation2 + $0xd0] sm:$0xff] }
  0x74   : > { %v542_v3 = vld [vmem:[%s5103_s3] sm:$0xff]  ;;  %v3398_v28 = vld [vmem:[%s5103_s3 + $0x8] sm:$0xff]  ;;  %v945_v41 = vld [vmem:[#allocation2 + $0xf0] sm:$0xff] }
  0x75   : > { %4142 = vmatpush3.bf16.msra.mxu0 %v4141_v55  ;;  %v1731_v55 = vld [vmem:[#allocation2 + $0x210] sm:$0xff]  ;;  %v627_v13 = vld [vmem:[#allocation2 + $0x60] sm:$0xff]  ;;  %v940_v32 = vld [vmem:[#allocation2 + $0xc8] sm:$0xff] }
  0x76   : > { %4144 = vmatprep.subr.bf16.mxu0 %v4143_v56  ;;  %v1732_v56 = vld [vmem:[#allocation2 + $0x218] sm:$0xff]  ;;  %v939_v31 = vld [vmem:[#allocation2 + $0xc0] sm:$0xff]  ;;  %v1414_v49 = vld [vmem:[#allocation2 + $0x188] sm:$0xff] }
  0x77   : > { %v4247_v57 = vpack.c.bf16 %v1732_v56, %v1731_v55  ;;  %v4184_v34 = vpack.c.bf16 %v940_v32, %v939_v31  ;;  %v943_v38 = vld [vmem:[#allocation2 + $0xe0] sm:$0xff]  ;;  %v3406_v44 = vld [vmem:[%s5103_s3 + $0x18] sm:$0xff]  ;;  %v3414_v50 = vld [vmem:[%s5103_s3 + $0x28] sm:$0xff] }
  0x78   : > { %v3410_v47 = vld [vmem:[%s5103_s3 + $0x20] sm:$0xff]  ;;  %v1415_v52 = vld [vmem:[#allocation2 + $0x190] sm:$0xff]  ;;  %v1416_v53 = vld [vmem:[#allocation2 + $0x198] sm:$0xff] }
  0x79   : > { %4146 = vmatpush3.bf16.msra.mxu0 %v4145_v59  ;;  %v1734_v59 = vld [vmem:[#allocation2 + $0x228] sm:$0xff]  ;;  %v1417_v55 = vld [vmem:[#allocation2 + $0x1a0] sm:$0xff] }
  0x7a   : > { %4171 = vmatprep.subr.bf16.mxu0 %v4549_v0  ;;  %v4250_v60 = vpack.c.bf16 %v1734_v59, %v1733_v58  ;;  %v1418_v56 = vld [vmem:[#allocation2 + $0x1a8] sm:$0xff]  ;;  %v1419_v58 = vld [vmem:[#allocation2 + $0x1b0] sm:$0xff]  ;;  %v1420_v59 = vld [vmem:[#allocation2 + $0x1b8] sm:$0xff] }
  0x7b   : > { %v2212_v31 = vld [vmem:[#allocation4 + $0xa0] sm:$0xff]  ;;  %v2213_v32 = vld [vmem:[#allocation4 + $0xa8] sm:$0xff] }
  0x7c   : > { %449 = vmatmul.mubr.f32.vlgmr.msra.gmra.mrb[0].mxu0 %v348_v26  ;;  %v1104_v26 = vld [vmem:[#allocation2 + $0x138] sm:$0xff] }
  0x7d   : > { %4173 = vmatpush3.bf16.msra.mxu0 %v4172_v62  ;;  %3747 = vmatprep.mubr.msk.f32.mxu0 %vm4550_vm0, %v4551_v12  ;;  %v4205_v27 = vpack.c.bf16 %v1104_v26, %v1103_v25  ;;  %v1736_v62 = vld [vmem:[#allocation2 + $0x238] sm:$0xff] }
  0x7e   : > { %4174 = vmatprep.subr.bf16.mxu0 %v4549_v0  ;;  %v4253_v63 = vpack.c.bf16 %v1736_v62, %v1735_v61  ;;  %v454_v61 = vld [vmem:[%s5104_s4] sm:$0xff]  ;;  %v4552_v62 = vmov 0  }
  0x7f   : > { %4442 = vset.pattern.permute.xlu0 %v4552_v62  ;;  %v2829_v62 = vld [vmem:[#allocation4 + $0x188] sm:$0xff] }
  0x80   : > { %457 = vperm.xlu0 %4442, %v454_v61   ;;  %v2828_v61 = vld [vmem:[#allocation4 + $0x180] sm:$0xff] }
  0x81   : > { %4176 = vmatpush3.bf16.msra.mxu0 %v4175_v2  ;;  %v624_v2 = vld [vmem:[#allocation2 + $0x48] sm:$0xff] }
  0x82   : > { %4177 = vmatprep.subr.bf16.mxu0 %v4549_v0  ;;  %v4160_v4 = vpack.c.bf16 %v624_v2, %v623_v1  ;;  %v3418_v1 = vld [vmem:[%s5103_s3 + $0x30] sm:$0xff] }
  0x85   : > { %4179 = vmatpush3.bf16.msra.mxu0 %v4178_v5 }
  0x86   : > { %4180 = vmatprep.subr.bf16.mxu0 %v4549_v0 }
  0x89   : > { %4182 = vmatpush3.bf16.msra.mxu0 %v4181_v8  ;;  %v626_v8 = vld [vmem:[#allocation2 + $0x58] sm:$0xff] }
  0x8a   : > { %4195 = vmatprep.subr.bf16.mxu0 %v4549_v0  ;;  %v4163_v11 = vpack.c.bf16 %v626_v8, %v625_v7  ;;  %v1897_v8 = vld [vmem:[#allocation4 + $0x10] sm:$0xff] }
 0x14f   : > { %v3482_v15 = vpop.f32.mrb[0].mxu0 }
 0x150   : > { %v3483_v16 = vpop.f32.mrb[1].mxu0 }
 0x151   : > { %v4834_v18 = vadd.f32 %v3483_v16, %v3482_v15  ;;  %v4166_v15 = vpack.c.bf16 %v628_v14, %v627_v13  ;;  %v629_v16 = vld [vmem:[#allocation2 + $0x70] sm:$0xff]  ;;  %v1900_v13 = vld [vmem:[#allocation4 + $0x28] sm:$0xff] }
 0x153   : > { %3700 = vmatmul.mubr.msk.f32.vlgmr.msra.gmra.mrb[0].mxu1 %vm468_vm1, %v4834_v18  ;;  %3748 = vmatmul.mubr.msk.f32.vlgmr.msra.gmra.mrb[2].mxu0 %vm468_vm1, %v4834_v18 }
 0x154   : > { %4197 = vmatpush3.bf16.msra.mxu0 %v4196_v17  ;;  %3795 = vmatprep.mubr.msk.f32.mxu0 %vm4550_vm0, %v4551_v12  ;;  %v630_v17 = vld [vmem:[#allocation2 + $0x78] sm:$0xff] }
 0x155   : > { %4198 = vmatprep.subr.bf16.mxu0 %v4549_v0  ;;  %3704 = vmatprep.mubr.msk.f32.mxu1 %vm4550_vm0, %v4551_v12  ;;  %v4169_v19 = vpack.c.bf16 %v630_v17, %v629_v16  ;;  %v1902_v16 = vld [vmem:[#allocation4 + $0x38] sm:$0xff] }
 0x158   : > { %4200 = vmatpush3.bf16.msra.mxu0 %v4199_v21 }
 0x159   : > { %4201 = vmatprep.subr.bf16.mxu0 %v4549_v0 }
 0x15c   : > { %4203 = vmatpush3.bf16.msra.mxu0 %v4202_v24 }
 0x15d   : > { %4204 = vmatprep.subr.bf16.mxu0 %v4549_v0 }
 0x160   : > { %4206 = vmatpush3.bf16.msra.mxu0 %v4205_v27 }
 0x161   : > { %4207 = vmatprep.subr.bf16.mxu0 %v4549_v0 }
 0x163   : > { %3796 = vmatmul.mubr.msk.f32.vlgmr.msra.gmra.mrb[4].mxu0 %vm468_vm1, %v4834_v18 }
 0x164   : > { %4209 = vmatpush3.bf16.msra.mxu0 %v4208_v30  ;;  %3819 = vmatprep.mubr.msk.f32.mxu0 %vm4550_vm0, %v4551_v12 }
 0x165   : > { %4210 = vmatprep.subr.bf16.mxu0 %v4549_v0 }
 0x168   : > { %4212 = vmatpush3.bf16.msra.mxu0 %v4211_v33  ;;  %v3402_v33 = vld [vmem:[%s5103_s3 + $0x10] sm:$0xff] }
 0x169   : > { %4213 = vmatprep.subr.bf16.mxu0 %v4549_v0 }
 0x16c   : > { %4215 = vmatpush3.bf16.msra.mxu0 %v4214_v36  ;;  %v942_v36 = vld [vmem:[#allocation2 + $0xd8] sm:$0xff] }
 0x16d   : > { %4216 = vmatprep.subr.bf16.mxu0 %v4549_v0  ;;  %v4187_v37 = vpack.c.bf16 %v942_v36, %v941_v35  ;;  %v2215_v35 = vld [vmem:[#allocation4 + $0xb8] sm:$0xff] }
 0x170   : > { %4218 = vmatpush3.bf16.msra.mxu0 %v4217_v39  ;;  %v944_v39 = vld [vmem:[#allocation2 + $0xe8] sm:$0xff] }
 0x171   : > { %4231 = vmatprep.subr.bf16.mxu0 %v4549_v0  ;;  %v4190_v40 = vpack.c.bf16 %v944_v39, %v943_v38  ;;  %v2364_v38 = vld [vmem:[#allocation4 + $0xc8] sm:$0xff] }
 0x173   : > { %3820 = vmatmul.mubr.msk.f32.vlgmr.msra.gmra.mrb[6].mxu0 %vm468_vm1, %v4834_v18 }
 0x174   : > { %4233 = vmatpush3.bf16.msra.mxu0 %v4232_v42  ;;  %3867 = vmatprep.mubr.msk.f32.mxu0 %vm4550_vm0, %v4551_v12  ;;  %v946_v42 = vld [vmem:[#allocation2 + $0xf8] sm:$0xff] }
 0x175   : > { %4234 = vmatprep.subr.bf16.mxu0 %v4549_v0  ;;  %v4193_v43 = vpack.c.bf16 %v946_v42, %v945_v41  ;;  %v2366_v41 = vld [vmem:[#allocation4 + $0xd8] sm:$0xff] }
 0x178   : > { %4236 = vmatpush3.bf16.msra.mxu0 %v4235_v45 }
 0x179   : > { %4237 = vmatprep.subr.bf16.mxu0 %v4549_v0 }
 0x17c   : > { %4239 = vmatpush3.bf16.msra.mxu0 %v4238_v48  ;;  %v1413_v48 = vld [vmem:[#allocation2 + $0x180] sm:$0xff] }
 0x17d   : > { %4240 = vmatprep.subr.bf16.mxu0 %v4549_v0 }
 0x180   : > { %4242 = vmatpush3.bf16.msra.mxu0 %v4241_v51  ;;  %v4220_v51 = vpack.c.bf16 %v1414_v49, %v1413_v48  ;;  %v2673_v49 = vld [vmem:[#allocation4 + $0x140] sm:$0xff] }
 0x181   : > { %4243 = vmatprep.subr.bf16.mxu0 %v4549_v0 }
 0x183   : > { %3868 = vmatmul.mubr.msk.f32.vlgmr.msra.gmra.mrb[8].mxu0 %vm468_vm1, %v4834_v18 }
 0x184   : > { %4245 = vmatpush3.bf16.msra.mxu0 %v4244_v54  ;;  %3891 = vmatprep.mubr.msk.f32.mxu0 %vm4550_vm0, %v4551_v12  ;;  %v4223_v54 = vpack.c.bf16 %v1416_v53, %v1415_v52  ;;  %v2675_v52 = vld [vmem:[#allocation4 + $0x150] sm:$0xff]  ;;  %v2676_v53 = vld [vmem:[#allocation4 + $0x158] sm:$0xff] }
 0x185   : > { %4246 = vmatprep.subr.bf16.mxu0 %v4549_v0 }
 0x188   : > { %4248 = vmatpush3.bf16.msra.mxu0 %v4247_v57  ;;  %v4226_v57 = vpack.c.bf16 %v1418_v56, %v1417_v55  ;;  %v2677_v55 = vld [vmem:[#allocation4 + $0x160] sm:$0xff]  ;;  %v2678_v56 = vld [vmem:[#allocation4 + $0x168] sm:$0xff] }
 0x189   : > { %4249 = vmatprep.subr.bf16.mxu0 %v4549_v0 }
 0x18c   : > { %4251 = vmatpush3.bf16.msra.mxu0 %v4250_v60  ;;  %v4229_v60 = vpack.c.bf16 %v1420_v59, %v1419_v58  ;;  %v2679_v58 = vld [vmem:[#allocation4 + $0x170] sm:$0xff]  ;;  %v2680_v59 = vld [vmem:[#allocation4 + $0x178] sm:$0xff] }
 0x18d   : > { %4252 = vmatprep.subr.bf16.mxu0 %v4549_v0 }
 0x190   : > { %4254 = vmatpush3.bf16.msra.mxu0 %v4253_v63  ;;  %v1889_v63 = vld [vmem:[%s5107_s7] sm:$0xff] }
 0x191   : > { %3918 = vmatprep.subr.mxu0 %v4551_v12  ;;  %1892 = vperm.xlu0 %4442, %v1889_v63   ;;  %v4328_v63 = vpack.c.bf16 %v2829_v62, %v2828_v61  ;;  %v2523_v61 = vld [vmem:[#allocation4 + $0x128] sm:$0xff] }
 0x193   : > { %3892 = vmatmul.mubr.msk.f32.vlgmr.msra.gmra.mrb[10].mxu0 %vm468_vm1, %v4834_v18 }
 0x194   : > { %3920 = vmatprep.mubr.msk.f32.mxu0 %vm4550_vm0, %v4551_v12 }
 0x226   : > { %v538_v5 = vpop.f32.mrb[0].mxu1  ;;  %v855_v6 = vpop.f32.mrb[2].mxu0 }
 0x227   : > { %v3701_v9 = vpop.f32.mrb[1].mxu1  ;;  %3703 = vmatpush3.msk.msra.mxu1 %vm547_vm2, %v538_v5  ;;  %v3749_v10 = vpop.f32.mrb[3].mxu0  ;;  %v1896_v5 = vld [vmem:[#allocation4 + $0x8] sm:$0xff] }
 0x228   : > { %4159 = vmatprep.subr.bf16.mxu1 %v4549_v0  ;;  %3705 = vmatmul.mubr.msk.f32.vlgmr.msra.gmra.mrb[2].mxu1 %vm543_vm3, %v542_v3  ;;  %v3422_v3 = vld [vmem:[%s5103_s3 + $0x38] sm:$0xff] }
 0x229   : > { %4161 = vmatpush3.bf16.msra.mxu1 %v4160_v4  ;;  %3723 = vmatprep.mubr.msk.f32.mxu1 %vm4550_vm0, %v4551_v12  ;;  %v1895_v4 = vld [vmem:[#allocation4] sm:$0xff]  ;;  %v1898_v9 = vld [vmem:[#allocation4 + $0x18] sm:$0xff] }
 0x22a   : > { %4162 = vmatprep.subr.bf16.mxu1 %v4549_v0  ;;  %v4256_v7 = vpack.c.bf16 %v1896_v5, %v1895_v4  ;;  %v4259_v10 = vpack.c.bf16 %v1898_v9, %v1897_v8  ;;  %v2833_v4 = vld [vmem:[#allocation4 + $0x1a8] sm:$0xff]  ;;  %v3138_v9 = vld [vmem:[#allocation4 + $0x200] sm:$0xff] }
 0x22d   : > { %4164 = vmatpush3.bf16.msra.mxu1 %v4163_v11  ;;  %v1899_v11 = vld [vmem:[#allocation4 + $0x20] sm:$0xff] }
 0x22e   : > { %4165 = vmatprep.subr.bf16.mxu1 %v4549_v0  ;;  %v4262_v14 = vpack.c.bf16 %v1900_v13, %v1899_v11  ;;  %v3140_v13 = vld [vmem:[#allocation4 + $0x210] sm:$0xff] }
 0x231   : > { %4167 = vmatpush3.bf16.msra.mxu1 %v4166_v15  ;;  %v1901_v15 = vld [vmem:[#allocation4 + $0x30] sm:$0xff] }
 0x232   : > { %4168 = vmatprep.subr.bf16.mxu1 %v4549_v0  ;;  %v4265_v17 = vpack.c.bf16 %v1902_v16, %v1901_v15  ;;  %v3142_v16 = vld [vmem:[#allocation4 + $0x220] sm:$0xff] }
 0x235   : > { %4170 = vmatpush3.bf16.msra.mxu1 %v4169_v19  ;;  %v458_v19 = vpop.permute.xlu0 %457 }
 0x236   : > { %v1171_v20 = vpop.f32.mrb[4].mxu0  ;;  %3726 = vmatprep.subr.mxu1 %v4551_v12 }
 0x237   : > { %v3797_v21 = vpop.f32.mrb[5].mxu0 }
 0x238   : > { %3724 = vmatmul.mubr.msk.f32.vlgmr.msra.gmra.mrb[4].mxu1 %vm468_vm1, %v4834_v18  ;;  %v2208_v21 = vld [vmem:[#allocation4 + $0x80] sm:$0xff] }
 0x239   : > { %3728 = vmatprep.mubr.msk.f32.mxu1 %vm4550_vm0, %v4551_v12 }
 0x246   : > { %v1329_v22 = vpop.f32.mrb[6].mxu0 }
 0x247   : > { %v3821_v23 = vpop.f32.mrb[7].mxu0 }
 0x256   : > { %v4892_v24 = vpop.f32.mrb[8].mxu0 }
 0x257   : > { %v3869_v25 = vpop.f32.mrb[9].mxu0 }
 0x266   : > { %v4894_v26 = vpop.f32.mrb[10].mxu0 }
 0x267   : > { %v3893_v27 = vpop.f32.mrb[11].mxu0 }
 0x268   : > { %v2210_v27 = vld [vmem:[#allocation4 + $0x90] sm:$0xff] }
 0x30b   : > { %v697_v29 = vpop.f32.mrb[4].mxu1 }
 0x30c   : > { %v3725_v30 = vpop.f32.mrb[5].mxu1  ;;  %3727 = vmatpush3.msk.msra.mxu1 %vm547_vm2, %v697_v29 }
 0x30d   : > { %3729 = vmatmul.mubr.msk.f32.vlgmr.msra.gmra.mrb[2].mxu1 %vm543_vm3, %v3398_v28  ;;  %3750 = vmatprep.subr.mxu1 %v4551_v12  ;;  %v2211_v28 = vld [vmem:[#allocation4 + $0x98] sm:$0xff] }
 0x30e   : > { %3751 = vmatpush3.msk.msra.mxu1 %vm547_vm2, %v855_v6  ;;  %3752 = vmatprep.mubr.msk.f32.mxu1 %vm4550_vm0, %v4551_v12  ;;  %v3426_v6 = vld [vmem:[%s5103_s3 + $0x40] sm:$0xff]  ;;  %v4283_v30 = vpack.c.bf16 %v2211_v28, %v2210_v27  ;;  %v2055_v28 = vld [vmem:[#allocation4 + $0x50] sm:$0xff] }
 0x30f   : > { %4183 = vmatprep.subr.bf16.mxu1 %v4549_v0 }
 0x315   : > { %3753 = vmatmul.mubr.msk.f32.vlgmr.msra.gmra.mrb[2].mxu1 %vm543_vm3, %v3402_v33  ;;  %v4286_v33 = vpack.c.bf16 %v2213_v32, %v2212_v31 }
 0x316   : > { %4185 = vmatpush3.bf16.msra.mxu1 %v4184_v34  ;;  %3771 = vmatprep.mubr.msk.f32.mxu1 %vm4550_vm0, %v4551_v12  ;;  %v2214_v34 = vld [vmem:[#allocation4 + $0xb0] sm:$0xff] }
 0x317   : > { %4186 = vmatprep.subr.bf16.mxu1 %v4549_v0  ;;  %v4289_v36 = vpack.c.bf16 %v2215_v35, %v2214_v34  ;;  %v2058_v34 = vld [vmem:[#allocation4 + $0x68] sm:$0xff] }
 0x31a   : > { %4188 = vmatpush3.bf16.msra.mxu1 %v4187_v37  ;;  %v2363_v37 = vld [vmem:[#allocation4 + $0xc0] sm:$0xff] }
 0x31b   : > { %4189 = vmatprep.subr.bf16.mxu1 %v4549_v0  ;;  %v4292_v39 = vpack.c.bf16 %v2364_v38, %v2363_v37  ;;  %v2060_v37 = vld [vmem:[#allocation4 + $0x78] sm:$0xff] }
 0x31e   : > { %4191 = vmatpush3.bf16.msra.mxu1 %v4190_v40  ;;  %v2365_v40 = vld [vmem:[#allocation4 + $0xd0] sm:$0xff] }
 0x31f   : > { %4192 = vmatprep.subr.bf16.mxu1 %v4549_v0  ;;  %v4295_v42 = vpack.c.bf16 %v2366_v41, %v2365_v40 }
 0x322   : > { %4194 = vmatpush3.bf16.msra.mxu1 %v4193_v43  ;;  %v2367_v43 = vld [vmem:[#allocation4 + $0xe0] sm:$0xff] }
 0x323   : > { %3774 = vmatprep.subr.mxu1 %v4551_v12 }
 0x325   : > { %3772 = vmatmul.mubr.msk.f32.vlgmr.msra.gmra.mrb[6].mxu1 %vm468_vm1, %v4834_v18 }
 0x326   : > { %3776 = vmatprep.mubr.msk.f32.mxu1 %vm4550_vm0, %v4551_v12 }
 0x3f8   : > { %v1013_v45 = vpop.f32.mrb[6].mxu1 }
 0x3f9   : > { %v3773_v46 = vpop.f32.mrb[7].mxu1  ;;  %3775 = vmatpush3.msk.msra.mxu1 %vm547_vm2, %v1013_v45 }
 0x3fa   : > { %3777 = vmatmul.mubr.msk.f32.vlgmr.msra.gmra.mrb[2].mxu1 %vm543_vm3, %v3406_v44  ;;  %3798 = vmatprep.subr.mxu1 %v4551_v12  ;;  %v2368_v44 = vld [vmem:[#allocation4 + $0xe8] sm:$0xff]  ;;  %v2369_v46 = vld [vmem:[#allocation4 + $0xf0] sm:$0xff] }
 0x3fb   : > { %3799 = vmatpush3.msk.msra.mxu1 %vm547_vm2, %v1171_v20  ;;  %3800 = vmatprep.mubr.msk.f32.mxu1 %vm4550_vm0, %v4551_v12  ;;  %v4298_v45 = vpack.c.bf16 %v2368_v44, %v2367_v43 }
 0x3fc   : > { %3822 = vmatprep.subr.mxu1 %v4551_v12 }
 0x402   : > { %3801 = vmatmul.mubr.msk.f32.vlgmr.msra.gmra.mrb[2].mxu1 %vm543_vm3, %v3410_v47  ;;  %v2370_v47 = vld [vmem:[#allocation4 + $0xf8] sm:$0xff] }
 0x403   : > { %3823 = vmatpush3.msk.msra.mxu1 %vm547_vm2, %v1329_v22  ;;  %3824 = vmatprep.mubr.msk.f32.mxu1 %vm4550_vm0, %v4551_v12  ;;  %v2209_v22 = vld [vmem:[#allocation4 + $0x88] sm:$0xff]  ;;  %v4301_v48 = vpack.c.bf16 %v2370_v47, %v2369_v46 }
 0x404   : > { %4219 = vmatprep.subr.bf16.mxu1 %v4549_v0 }
 0x40a   : > { %3825 = vmatmul.mubr.msk.f32.vlgmr.msra.gmra.mrb[2].mxu1 %vm543_vm3, %v3414_v50  ;;  %v2674_v50 = vld [vmem:[#allocation4 + $0x148] sm:$0xff] }
 0x40b   : > { %4221 = vmatpush3.bf16.msra.mxu1 %v4220_v51  ;;  %3843 = vmatprep.mubr.msk.f32.mxu1 %vm4550_vm0, %v4551_v12  ;;  %v4316_v51 = vpack.c.bf16 %v2674_v50, %v2673_v49  ;;  %v2132_v49 = vld [vmem:[#allocation6 + $0x8] sm:$0xff] }
 0x40c   : > { %4222 = vmatprep.subr.bf16.mxu1 %v4549_v0 }
 0x40f   : > { %4224 = vmatpush3.bf16.msra.mxu1 %v4223_v54  ;;  %v4319_v54 = vpack.c.bf16 %v2676_v53, %v2675_v52  ;;  %v2287_v52 = vld [vmem:[#allocation6 + $0x10] sm:$0xff]  ;;  %v2518_v53 = vld [vmem:[#allocation4 + $0x100] sm:$0xff] }
 0x410   : > { %4225 = vmatprep.subr.bf16.mxu1 %v4549_v0 }
 0x413   : > { %4227 = vmatpush3.bf16.msra.mxu1 %v4226_v57  ;;  %v4322_v57 = vpack.c.bf16 %v2678_v56, %v2677_v55  ;;  %v2442_v55 = vld [vmem:[#allocation6 + $0x18] sm:$0xff] }
 0x414   : > { %4228 = vmatprep.subr.bf16.mxu1 %v4549_v0 }
 0x417   : > { %4230 = vmatpush3.bf16.msra.mxu1 %v4229_v60  ;;  %v4325_v60 = vpack.c.bf16 %v2680_v59, %v2679_v58  ;;  %v2521_v58 = vld [vmem:[#allocation4 + $0x118] sm:$0xff] }
 0x418   : > { %3846 = vmatprep.subr.mxu1 %v4551_v12 }
 0x41a   : > { %3844 = vmatmul.mubr.msk.f32.vlgmr.msra.gmra.mrb[8].mxu1 %vm468_vm1, %v4834_v18 }
 0x41b   : > { %3848 = vmatprep.mubr.msk.f32.mxu1 %vm4550_vm0, %v4551_v12 }
 0x4ed   : > { %v1487_v18 = vpop.f32.mrb[8].mxu1 }
 0x4ee   : > { %v3845_v2 = vpop.f32.mrb[9].mxu1  ;;  %3847 = vmatpush3.msk.msra.mxu1 %vm547_vm2, %v1487_v18  ;;  %v2831_v18 = vld [vmem:[#allocation4 + $0x198] sm:$0xff] }
 0x4ef   : > { %3849 = vmatmul.mubr.msk.f32.vlgmr.msra.gmra.mrb[2].mxu1 %vm543_vm3, %v3418_v1  ;;  %3870 = vmatprep.subr.mxu1 %v4551_v12  ;;  %v2830_v1 = vld [vmem:[#allocation4 + $0x190] sm:$0xff] }
 0x4f0   : > { %3871 = vmatpush3.msk.msra.mxu1 %vm547_vm2, %v4892_v24  ;;  %3872 = vmatprep.mubr.msk.f32.mxu1 %vm4550_vm0, %v4551_v12  ;;  %v4331_v2 = vpack.c.bf16 %v2831_v18, %v2830_v1  ;;  %v2525_v1 = vld [vmem:[#allocation4 + $0x138] sm:$0xff] }
 0x4f1   : > { %3894 = vmatprep.subr.mxu1 %v4551_v12 }
 0x4f7   : > { %3873 = vmatmul.mubr.msk.f32.vlgmr.msra.gmra.mrb[2].mxu1 %vm543_vm3, %v3422_v3  ;;  %v2832_v3 = vld [vmem:[#allocation4 + $0x1a0] sm:$0xff] }
 0x4f8   : > { %3895 = vmatpush3.msk.msra.mxu1 %vm547_vm2, %v4894_v26  ;;  %3896 = vmatprep.mubr.msk.f32.mxu1 %vm4550_vm0, %v4551_v12  ;;  %v4280_v26 = vpack.c.bf16 %v2209_v22, %v2208_v21  ;;  %v4334_v5 = vpack.c.bf16 %v2833_v4, %v2832_v3  ;;  %v3145_v21 = vld [vmem:[#allocation4 + $0x238] sm:$0xff] }
 0x4f9   : > { %4255 = vmatprep.subr.bf16.mxu1 %v4549_v0 }
 0x4ff   : > { %3897 = vmatmul.mubr.msk.f32.vlgmr.msra.gmra.mrb[2].mxu1 %vm543_vm3, %v3426_v6  ;;  %v2834_v6 = vld [vmem:[#allocation4 + $0x1b0] sm:$0xff] }
 0x500   : > { %4257 = vmatpush3.bf16.msra.mxu1 %v4256_v7  ;;  %3915 = vmatprep.mubr.msk.f32.mxu1 %vm4550_vm0, %v4551_v12  ;;  %v2835_v7 = vld [vmem:[#allocation4 + $0x1b8] sm:$0xff] }
 0x501   : > { %4258 = vmatprep.subr.bf16.mxu1 %v4549_v0  ;;  %v4337_v8 = vpack.c.bf16 %v2835_v7, %v2834_v6  ;;  %v2983_v6 = vld [vmem:[#allocation4 + $0x1c0] sm:$0xff]  ;;  %v2984_v7 = vld [vmem:[#allocation4 + $0x1c8] sm:$0xff] }
 0x504   : > { %4260 = vmatpush3.bf16.msra.mxu1 %v4259_v10  ;;  %v3139_v10 = vld [vmem:[#allocation4 + $0x208] sm:$0xff] }
 0x505   : > { %4261 = vmatprep.subr.bf16.mxu1 %v4549_v0  ;;  %v4352_v11 = vpack.c.bf16 %v3139_v10, %v3138_v9  ;;  %v4340_v9 = vpack.c.bf16 %v2984_v7, %v2983_v6  ;;  %v2985_v10 = vld [vmem:[#allocation4 + $0x1d0] sm:$0xff] }
 0x508   : > { %4263 = vmatpush3.bf16.msra.mxu1 %v4262_v14  ;;  %v3141_v14 = vld [vmem:[#allocation4 + $0x218] sm:$0xff] }
 0x509   : > { %4264 = vmatprep.subr.bf16.mxu1 %v4549_v0  ;;  %v4355_v15 = vpack.c.bf16 %v3141_v14, %v3140_v13  ;;  %v2987_v14 = vld [vmem:[#allocation4 + $0x1e0] sm:$0xff] }
 0x50c   : > { %4266 = vmatpush3.bf16.msra.mxu1 %v4265_v17  ;;  %v3143_v17 = vld [vmem:[#allocation4 + $0x228] sm:$0xff] }
 0x50d   : > { %4279 = vmatprep.subr.bf16.mxu1 %v4549_v0 }
 0x5d2   : > { %v1881_v20 = vpop.f32.mrb[2].mxu1 }
 0x5d3   : > { %v4363_v23 = vadd.f32 %v1881_v20, %v458_v19  ;;  %v3898_v24 = vpop.f32.mrb[3].mxu1  ;;  %v4358_v19 = vpack.c.bf16 %v3143_v17, %v3142_v16  ;;  %v3144_v20 = vld [vmem:[#allocation4 + $0x230] sm:$0xff] }
 0x5d4   : > { %v4361_v22 = vpack.c.bf16 %v3145_v21, %v3144_v20  ;;  %v2054_v24 = vld [vmem:[#allocation4 + $0x48] sm:$0xff]  ;;  %v2989_v17 = vld [vmem:[#allocation4 + $0x1f0] sm:$0xff]  ;;  %v3062_v21 = vld [vmem:[#allocation6 + $0x38] sm:$0xff] }
 0x5d5   : > { %vm1886_vm4 = vcmp.gt.f32.partialorder %v4363_v23, 0.0  ;;  %v1887_v25 = vmul.f32 0.2, %v4363_v23 }
 0x5d7   : > { %v4988_v29 = vsel %vm1886_vm4, %v4363_v23, %v1887_v25  ;;  %v2053_v23 = vld [vmem:[#allocation4 + $0x40] sm:$0xff] }
 0x5d8   : > { %3916 = vmatmul.mubr.msk.f32.vlgmr.msra.gmra.mrb[10].mxu1 %vm468_vm1, %v4988_v29  ;;  %v1976_v25 = vld [vmem:[#allocation6] sm:$0xff] }
 0x5d9   : > { %4281 = vmatpush3.bf16.msra.mxu1 %v4280_v26  ;;  %3963 = vmatprep.mubr.msk.f32.mxu1 %vm4550_vm0, %v4551_v12  ;;  %v4268_v26 = vpack.c.bf16 %v2054_v24, %v2053_v23 }
 0x5da   : > { %4282 = vmatprep.subr.bf16.mxu1 %v4549_v0 }
 0x5dd   : > { %4284 = vmatpush3.bf16.msra.mxu1 %v4283_v30  ;;  %v2056_v30 = vld [vmem:[#allocation4 + $0x58] sm:$0xff] }
 0x5de   : > { %4285 = vmatprep.subr.bf16.mxu1 %v4549_v0  ;;  %v4271_v32 = vpack.c.bf16 %v2056_v30, %v2055_v28 }
 0x5e1   : > { %4287 = vmatpush3.bf16.msra.mxu1 %v4286_v33  ;;  %v2057_v33 = vld [vmem:[#allocation4 + $0x60] sm:$0xff] }
 0x5e2   : > { %4288 = vmatprep.subr.bf16.mxu1 %v4549_v0  ;;  %v4274_v35 = vpack.c.bf16 %v2058_v34, %v2057_v33 }
 0x5e5   : > { %4290 = vmatpush3.bf16.msra.mxu1 %v4289_v36  ;;  %v2059_v36 = vld [vmem:[#allocation4 + $0x70] sm:$0xff] }
 0x5e6   : > { %4291 = vmatprep.subr.bf16.mxu1 %v4549_v0  ;;  %v4277_v38 = vpack.c.bf16 %v2060_v37, %v2059_v36 }
 0x5e8   : > { %3964 = vmatmul.mubr.msk.f32.vlgmr.msra.gmra.mrb[12].mxu1 %vm468_vm1, %v4988_v29 }
 0x5e9   : > { %4293 = vmatpush3.bf16.msra.mxu1 %v4292_v39  ;;  %3987 = vmatprep.mubr.msk.f32.mxu1 %vm4550_vm0, %v4551_v12 }
 0x5ea   : > { %4294 = vmatprep.subr.bf16.mxu1 %v4549_v0 }
 0x5ed   : > { %4296 = vmatpush3.bf16.msra.mxu1 %v4295_v42 }
 0x5ee   : > { %4297 = vmatprep.subr.bf16.mxu1 %v4549_v0 }
 0x5f1   : > { %4299 = vmatpush3.bf16.msra.mxu1 %v4298_v45 }
 0x5f2   : > { %4300 = vmatprep.subr.bf16.mxu1 %v4549_v0 }
 0x5f5   : > { %4302 = vmatpush3.bf16.msra.mxu1 %v4301_v48 }
 0x5f6   : > { %4315 = vmatprep.subr.bf16.mxu1 %v4549_v0 }
 0x5f8   : > { %3988 = vmatmul.mubr.msk.f32.vlgmr.msra.gmra.mrb[14].mxu1 %vm468_vm1, %v4988_v29 }
 0x5f9   : > { %4317 = vmatpush3.bf16.msra.mxu1 %v4316_v51  ;;  %4035 = vmatprep.mubr.msk.f32.mxu1 %vm4550_vm0, %v4551_v12 }
 0x5fa   : > { %4318 = vmatprep.subr.bf16.mxu1 %v4549_v0 }
 0x5fd   : > { %4320 = vmatpush3.bf16.msra.mxu1 %v4319_v54  ;;  %v2519_v54 = vld [vmem:[#allocation4 + $0x108] sm:$0xff] }
 0x5fe   : > { %4321 = vmatprep.subr.bf16.mxu1 %v4549_v0  ;;  %v4304_v56 = vpack.c.bf16 %v2519_v54, %v2518_v53 }
 0x601   : > { %4323 = vmatpush3.bf16.msra.mxu1 %v4322_v57  ;;  %v2520_v57 = vld [vmem:[#allocation4 + $0x110] sm:$0xff] }
 0x602   : > { %4324 = vmatprep.subr.bf16.mxu1 %v4549_v0  ;;  %v4307_v59 = vpack.c.bf16 %v2521_v58, %v2520_v57 }
 0x605   : > { %4326 = vmatpush3.bf16.msra.mxu1 %v4325_v60  ;;  %v2522_v60 = vld [vmem:[#allocation4 + $0x120] sm:$0xff] }
 0x606   : > { %4327 = vmatprep.subr.bf16.mxu1 %v4549_v0  ;;  %v4310_v62 = vpack.c.bf16 %v2523_v61, %v2522_v60 }
 0x608   : > { %4036 = vmatmul.mubr.msk.f32.vlgmr.msra.gmra.mrb[16].mxu1 %vm468_vm1, %v4988_v29 }
 0x609   : > { %4329 = vmatpush3.bf16.msra.mxu1 %v4328_v63  ;;  %4059 = vmatprep.mubr.msk.f32.mxu1 %vm4550_vm0, %v4551_v12  ;;  %v2524_v63 = vld [vmem:[#allocation4 + $0x130] sm:$0xff] }
 0x60a   : > { %4330 = vmatprep.subr.bf16.mxu1 %v4549_v0  ;;  %v4313_v18 = vpack.c.bf16 %v2525_v1, %v2524_v63 }
 0x60d   : > { %4332 = vmatpush3.bf16.msra.mxu1 %v4331_v2  ;;  %v2597_v2 = vld [vmem:[#allocation6 + $0x20] sm:$0xff] }
 0x60e   : > { %4333 = vmatprep.subr.bf16.mxu1 %v4549_v0 }
 0x611   : > { %4335 = vmatpush3.bf16.msra.mxu1 %v4334_v5  ;;  %v2752_v5 = vld [vmem:[#allocation6 + $0x28] sm:$0xff] }
 0x612   : > { %4336 = vmatprep.subr.bf16.mxu1 %v4549_v0 }
 0x615   : > { %4338 = vmatpush3.bf16.msra.mxu1 %v4337_v8  ;;  %v2907_v8 = vld [vmem:[#allocation6 + $0x30] sm:$0xff] }
 0x616   : > { %4351 = vmatprep.subr.bf16.mxu1 %v4549_v0 }
 0x618   : > { %4060 = vmatmul.mubr.msk.f32.vlgmr.msra.gmra.mrb[18].mxu1 %vm468_vm1, %v4988_v29 }
 0x619   : > { %4353 = vmatpush3.bf16.msra.mxu1 %v4352_v11  ;;  %4107 = vmatprep.mubr.msk.f32.mxu1 %vm4550_vm0, %v4551_v12  ;;  %v2986_v11 = vld [vmem:[#allocation4 + $0x1d8] sm:$0xff] }
 0x61a   : > { %4354 = vmatprep.subr.bf16.mxu1 %v4549_v0  ;;  %v4343_v13 = vpack.c.bf16 %v2986_v11, %v2985_v10 }
 0x61d   : > { %4356 = vmatpush3.bf16.msra.mxu1 %v4355_v15  ;;  %v2988_v15 = vld [vmem:[#allocation4 + $0x1e8] sm:$0xff] }
 0x61e   : > { %4357 = vmatprep.subr.bf16.mxu1 %v4549_v0  ;;  %v4346_v16 = vpack.c.bf16 %v2988_v15, %v2987_v14 }
 0x621   : > { %4359 = vmatpush3.bf16.msra.mxu1 %v4358_v19  ;;  %v2990_v19 = vld [vmem:[#allocation4 + $0x1f8] sm:$0xff] }
 0x622   : > { %4360 = vmatprep.subr.bf16.mxu1 %v4549_v0  ;;  %v4349_v20 = vpack.c.bf16 %v2990_v19, %v2989_v17 }
 0x625   : > { %4362 = vmatpush3.bf16.msra.mxu1 %v4361_v22 }
 0x628   : > { %4108 = vmatmul.mubr.msk.f32.vlgmr.msra.gmra.mrb[20].mxu1 %vm468_vm1, %v4988_v29 }
 0x6ab   : > { %v1972_v27 = vpop.f32.mrb[10].mxu1 }
 0x6ac   : > { %v3917_v31 = vpop.f32.mrb[11].mxu1  ;;  %3919 = vmatpush3.msra.mxu0 %v1972_v27 }
 0x6ad   : > { %4267 = vmatprep.subr.bf16.mxu0 %v4549_v0  ;;  %3921 = vmatmul.mubr.msk.f32.vlgmr.msra.gmra.mrb[12].mxu0 %vm1977_vm5, %v1976_v25 }
 0x6ae   : > { %4269 = vmatpush3.bf16.msra.mxu0 %v4268_v26  ;;  %3939 = vmatprep.mubr.msk.f32.mxu0 %vm4550_vm0, %v4551_v12 }
 0x6af   : > { %4270 = vmatprep.subr.bf16.mxu0 %v4549_v0 }
 0x6b2   : > { %4272 = vmatpush3.bf16.msra.mxu0 %v4271_v32 }
 0x6b3   : > { %4273 = vmatprep.subr.bf16.mxu0 %v4549_v0 }
 0x6b6   : > { %4275 = vmatpush3.bf16.msra.mxu0 %v4274_v35 }
 0x6b7   : > { %4276 = vmatprep.subr.bf16.mxu0 %v4549_v0 }
 0x6ba   : > { %4278 = vmatpush3.bf16.msra.mxu0 %v4277_v38 }
 0x6bb   : > { %v2282_v39 = vpop.f32.mrb[12].mxu1  ;;  %3942 = vmatprep.subr.mxu0 %v4551_v12 }
 0x6bc   : > { %v3965_v40 = vpop.f32.mrb[13].mxu1 }
 0x6bd   : > { %3940 = vmatmul.mubr.msk.f32.vlgmr.msra.gmra.mrb[14].mxu0 %vm468_vm1, %v4988_v29 }
 0x6be   : > { %3944 = vmatprep.mubr.msk.f32.mxu0 %vm4550_vm0, %v4551_v12 }
 0x6cb   : > { %v2437_v41 = vpop.f32.mrb[14].mxu1 }
 0x6cc   : > { %v3989_v42 = vpop.f32.mrb[15].mxu1 }
 0x6db   : > { %v2747_v43 = vpop.f32.mrb[16].mxu1 }
 0x6dc   : > { %v4037_v44 = vpop.f32.mrb[17].mxu1 }
 0x6eb   : > { %v2902_v45 = vpop.f32.mrb[18].mxu1 }
 0x6ec   : > { %v4061_v46 = vpop.f32.mrb[19].mxu1 }
 0x6fb   : > { %v5043_v47 = vpop.f32.mrb[20].mxu1 }
 0x6fc   : > { %v4109_v48 = vpop.f32.mrb[21].mxu1 }
 0x790   : > { %v2127_v50 = vpop.f32.mrb[14].mxu0 }
 0x791   : > { %v3941_v51 = vpop.f32.mrb[15].mxu0  ;;  %3943 = vmatpush3.msra.mxu0 %v2127_v50 }
 0x792   : > { %3945 = vmatmul.mubr.msk.f32.vlgmr.msra.gmra.mrb[12].mxu0 %vm1977_vm5, %v2132_v49  ;;  %3966 = vmatprep.subr.mxu0 %v4551_v12 }
 0x793   : > { %3967 = vmatpush3.msra.mxu0 %v2282_v39  ;;  %3968 = vmatprep.mubr.msk.f32.mxu0 %vm4550_vm0, %v4551_v12 }
 0x794   : > { %3990 = vmatprep.subr.mxu0 %v4551_v12 }
 0x79a   : > { %3969 = vmatmul.mubr.msk.f32.vlgmr.msra.gmra.mrb[12].mxu0 %vm1977_vm5, %v2287_v52 }
 0x79b   : > { %3991 = vmatpush3.msra.mxu0 %v2437_v41  ;;  %3992 = vmatprep.mubr.msk.f32.mxu0 %vm4550_vm0, %v4551_v12 }
 0x79c   : > { %4303 = vmatprep.subr.bf16.mxu0 %v4549_v0 }
 0x7a2   : > { %3993 = vmatmul.mubr.msk.f32.vlgmr.msra.gmra.mrb[12].mxu0 %vm1977_vm5, %v2442_v55 }
 0x7a3   : > { %4305 = vmatpush3.bf16.msra.mxu0 %v4304_v56  ;;  %4011 = vmatprep.mubr.msk.f32.mxu0 %vm4550_vm0, %v4551_v12 }
 0x7a4   : > { %4306 = vmatprep.subr.bf16.mxu0 %v4549_v0 }
 0x7a7   : > { %4308 = vmatpush3.bf16.msra.mxu0 %v4307_v59 }
 0x7a8   : > { %4309 = vmatprep.subr.bf16.mxu0 %v4549_v0 }
 0x7ab   : > { %4311 = vmatpush3.bf16.msra.mxu0 %v4310_v62 }
 0x7ac   : > { %4312 = vmatprep.subr.bf16.mxu0 %v4549_v0 }
 0x7af   : > { %4314 = vmatpush3.bf16.msra.mxu0 %v4313_v18 }
 0x7b0   : > { %4014 = vmatprep.subr.mxu0 %v4551_v12 }
 0x7b2   : > { %4012 = vmatmul.mubr.msk.f32.vlgmr.msra.gmra.mrb[16].mxu0 %vm468_vm1, %v4988_v29 }
 0x7b3   : > { %4016 = vmatprep.mubr.msk.f32.mxu0 %vm4550_vm0, %v4551_v12 }
 0x885   : > { %v2592_v3 = vpop.f32.mrb[16].mxu0 }
 0x886   : > { %v4013_v4 = vpop.f32.mrb[17].mxu0  ;;  %4015 = vmatpush3.msra.mxu0 %v2592_v3 }
 0x887   : > { %4017 = vmatmul.mubr.msk.f32.vlgmr.msra.gmra.mrb[12].mxu0 %vm1977_vm5, %v2597_v2  ;;  %4038 = vmatprep.subr.mxu0 %v4551_v12 }
 0x888   : > { %4039 = vmatpush3.msra.mxu0 %v2747_v43  ;;  %4040 = vmatprep.mubr.msk.f32.mxu0 %vm4550_vm0, %v4551_v12 }
 0x889   : > { %4062 = vmatprep.subr.mxu0 %v4551_v12 }
 0x88f   : > { %4041 = vmatmul.mubr.msk.f32.vlgmr.msra.gmra.mrb[12].mxu0 %vm1977_vm5, %v2752_v5 }
 0x890   : > { %4063 = vmatpush3.msra.mxu0 %v2902_v45  ;;  %4064 = vmatprep.mubr.msk.f32.mxu0 %vm4550_vm0, %v4551_v12 }
 0x891   : > { %4339 = vmatprep.subr.bf16.mxu0 %v4549_v0 }
 0x897   : > { %4065 = vmatmul.mubr.msk.f32.vlgmr.msra.gmra.mrb[12].mxu0 %vm1977_vm5, %v2907_v8 }
 0x898   : > { %4341 = vmatpush3.bf16.msra.mxu0 %v4340_v9  ;;  %4083 = vmatprep.mubr.msk.f32.mxu0 %vm4550_vm0, %v4551_v12 }
 0x899   : > { %4342 = vmatprep.subr.bf16.mxu0 %v4549_v0 }
 0x89c   : > { %4344 = vmatpush3.bf16.msra.mxu0 %v4343_v13 }
 0x89d   : > { %4345 = vmatprep.subr.bf16.mxu0 %v4549_v0 }
 0x8a0   : > { %4347 = vmatpush3.bf16.msra.mxu0 %v4346_v16 }
 0x8a1   : > { %4348 = vmatprep.subr.bf16.mxu0 %v4549_v0  ;;  %v3217_v0 = vld [vmem:[#allocation6 + $0x40] sm:$0xff] }
 0x8a4   : > { %4350 = vmatpush3.bf16.msra.mxu0 %v4349_v20 }
 0x8a5   : > { %4086 = vmatprep.subr.mxu0 %v4551_v12 }
 0x8a7   : > { %4084 = vmatmul.mubr.msk.f32.vlgmr.msra.gmra.mrb[18].mxu0 %vm468_vm1, %v4988_v29  ;;  %v1893_v29 = vpop.permute.xlu0 %1892 }
 0x8a8   : > { %4088 = vmatprep.mubr.msk.f32.mxu0 %vm4550_vm0, %v4551_v12 }
 0x97a   : > { %v3057_v22 = vpop.f32.mrb[18].mxu0 }
 0x97b   : > { %v4085_v23 = vpop.f32.mrb[19].mxu0  ;;  %4087 = vmatpush3.msra.mxu0 %v3057_v22 }
 0x97c   : > { %4089 = vmatmul.mubr.msk.f32.vlgmr.msra.gmra.mrb[12].mxu0 %vm1977_vm5, %v3062_v21  ;;  %4110 = vmatprep.subr.mxu0 %v4551_v12 }
 0x97d   : > { %4111 = vmatpush3.msra.mxu0 %v5043_v47  ;;  %4112 = vmatprep.mubr.msk.f32.mxu0 %vm4550_vm0, %v4551_v12 }
 0x984   : > { %4113 = vmatmul.mubr.msk.f32.vlgmr.msra.gmra.mrb[12].mxu0 %vm1977_vm5, %v3217_v0 }
 0xa57   : > { %v3287_v24 = vpop.f32.mrb[12].mxu0 }
 0xa58   : > { %v4364_v25 = vadd.f32 %v3287_v24, %v1893_v29  ;;  %v4114_v26 = vpop.f32.mrb[13].mxu0 }
 0xa5a   : > { %vm3292_vm6 = vcmp.gt.f32.partialorder %v4364_v25, 0.0  ;;  %v3293_v27 = vmul.f32 0.2, %v4364_v25 }
 0xa5c   : > { %v3294_v28 = vsel %vm3292_vm6, %v4364_v25, %v3293_v27 }
 0xa5d   : > { %3295 = vst.msk [vmem:[%s347_s15] sm:$0xff] %vm468_vm1, %v3294_v28 }
 0xa5e PF: > { %s20_s27 = sadd.s32 1, %s4542_s27  }
 0xa5f   : > { %p17_p9 = scmp.ge.s32.totalorder %s20_s27, 4  }
 0xa61   :  { %19 = sbr.rel (!%p17_p9) target bundleno = 2 (0x2), region = 127 }
 0xa68   :  { %3315 = vsyncpa [#allocation3], 1 }
 0xa69   :  { %3317 = vsyncpa [#allocation3 + $0x1], 1 }
 0xa6a   :  { %3318 = vsyncpa [#allocation5], 1 }

</bundles_post_ra>
